<compile_context>
chip_gen: v7x
topology: tpu7x:2x2x1
jax: 0.10.0
libtpu: 0.0.40
codegen_flags: <defaults>
</compile_context>

<pallas_src>
import jax
import jax.numpy as jnp
from jax.experimental import pallas as pl
from jax.experimental.pallas import tpu as pltpu

_LANE = 128        # lane width: all kernel outputs padded to this
_K_ALIGN = 16      # im2col K padding (bf16 sublane pairs)
_MAX_TM_CONV = 1024
_MAX_TM_MLP = 1024
_C1_OUT = 6        # LeNet conv1 output channels (fixed by the architecture)

_MOSAIC_PARAMS = pltpu.CompilerParams(
    dimension_semantics=("parallel",),
    vmem_limit_bytes=32 * 1024 * 1024,
)


def _round_up(x, m):
    return (x + m - 1) // m * m


def _row_tiling(m, max_tm):
    """Row tile (multiple of 16) + padded row count.

    Prefers >= 2 grid steps so "parallel" can shard across both TensorCores on
    v7x, while keeping tiles large enough to amortize the ~0.35 us/step
    pipeline overhead on v5e/v6e.
    """
    m16 = _round_up(m, 16)
    if m16 <= 16:
        return m16, m16
    tm = min(max_tm, _round_up(-(-m16 // 2), 16))
    return tm, _round_up(m16, tm)


# ----------------------------------------------------------------------------
# Pallas kernels
# ----------------------------------------------------------------------------
def _conv_relu_pool_kernel(x_ref, w_ref, b_ref, o_ref):
    """Fused conv-as-GEMM + 2x2 maxpool + bias + ReLU.

    x_ref: [4, tm, K] bf16 -- im2col patches, one slab per 2x2-pool corner
    w_ref: [K, 128]   bf16 -- conv weight, Cout zero-padded to 128 lanes
    b_ref: [1, 128]   f32
    o_ref: [tm, 128]  bf16 -- pooled activations (one row per pooled pixel)
    """
    four, tm, k = x_ref.shape
    # One MXU pass over all four corners (reshape is tile-aligned: tm % 16 == 0).
    x = x_ref[...].reshape(four * tm, k)
    d = jnp.dot(x, w_ref[...], preferred_element_type=jnp.float32)
    pooled = jnp.max(d.reshape(four, tm, d.shape[-1]), axis=0)
    # relu(max_c(x_c @ W) + b) == maxpool(relu(conv(x) + b)) since the bias is
    # per-channel and ReLU is monotone.
    o_ref[...] = jnp.maximum(pooled + b_ref[...], 0.0).astype(o_ref.dtype)


def _mlp_kernel(x_ref, w1_ref, b1_ref, w2_ref, b2_ref, w3_ref, b3_ref, o_ref):
    """Fused fc1+ReLU -> fc2+ReLU -> fc3; intermediates never leave VMEM."""
    h = jnp.dot(x_ref[...], w1_ref[...], preferred_element_type=jnp.float32)
    h = jnp.maximum(h + b1_ref[...], 0.0)
    h = jnp.dot(h.astype(jnp.bfloat16), w2_ref[...],
                preferred_element_type=jnp.float32)
    h = jnp.maximum(h + b2_ref[...], 0.0)
    h = jnp.dot(h.astype(jnp.bfloat16), w3_ref[...],
                preferred_element_type=jnp.float32)
    o_ref[...] = h + b3_ref[...]


# ----------------------------------------------------------------------------
# Kernel wrappers (row-tiled, parallel grid)
# ----------------------------------------------------------------------------
def conv_relu_pool(corners, w, b):
    """corners: [4, M, K] bf16; w: [K, 128] bf16; b: [1, 128] f32 -> [M, 128] bf16."""
    _, m, k = corners.shape
    n = w.shape[1]
    tm, m_pad = _row_tiling(m, _MAX_TM_CONV)
    if m_pad != m:
        corners = jnp.pad(corners, ((0, 0), (0, m_pad - m), (0, 0)))
    out = pl.pallas_call(
        _conv_relu_pool_kernel,
        out_shape=jax.ShapeDtypeStruct((m_pad, n), jnp.bfloat16),
        grid=(m_pad // tm,),
        in_specs=[
            pl.BlockSpec((4, tm, k), lambda i: (0, i, 0)),
            pl.BlockSpec((k, n), lambda i: (0, 0)),   # weights resident across grid
            pl.BlockSpec((1, n), lambda i: (0, 0)),
        ],
        out_specs=pl.BlockSpec((tm, n), lambda i: (i, 0)),
        compiler_params=_MOSAIC_PARAMS,
    )(corners, w, b)
    return out if m_pad == m else out[:m]


def mlp(x, w1, b1, w2, b2, w3, b3):
    """x: [M, K] bf16 -> [M, 128] f32 (fc outputs zero-padded to 128 lanes)."""
    m, k = x.shape
    n = w3.shape[1]
    tm, m_pad = _row_tiling(m, _MAX_TM_MLP)
    if m_pad != m:
        x = jnp.pad(x, ((0, m_pad - m), (0, 0)))
    full = lambda i: (0, 0)
    out = pl.pallas_call(
        _mlp_kernel,
        out_shape=jax.ShapeDtypeStruct((m_pad, n), jnp.float32),
        grid=(m_pad // tm,),
        in_specs=[
            pl.BlockSpec((tm, k), lambda i: (i, 0)),
            pl.BlockSpec(w1.shape, full), pl.BlockSpec(b1.shape, full),
            pl.BlockSpec(w2.shape, full), pl.BlockSpec(b2.shape, full),
            pl.BlockSpec(w3.shape, full), pl.BlockSpec(b3.shape, full),
        ],
        out_specs=pl.BlockSpec((tm, n), lambda i: (i, 0)),
        compiler_params=_MOSAIC_PARAMS,
    )(x, w1, b1, w2, b2, w3, b3)
    return out if m_pad == m else out[:m]


# ----------------------------------------------------------------------------
# Glue: pool-corner im2col on NHWC input (plain JAX, static shapes only)
# ----------------------------------------------------------------------------
def pool_corner_cols(x_nhwc, kh, kw):
    """im2col restricted to each 2x2-pool corner, channels-last.

    x: [B, H, W, C] -> ([4, B*PH*PW, K_pad], (B, PH, PW)) with column order
    (KH, KW, C) and K zero-padded to a multiple of 16. Corner (ci, cj) of row
    (b, p, q) is the patch whose conv output lands at (2p+ci, 2q+cj) -- exactly
    the 4 candidates of pooled pixel (p, q).
    """
    b, h, w, c = x_nhwc.shape
    oh, ow = h - kh + 1, w - kw + 1
    assert oh % 2 == 0 and ow % 2 == 0, "2x2 pool needs even conv output dims"
    ph, pw = oh // 2, ow // 2
    patches = [x_nhwc[:, i:i + oh, j:j + ow, :]
               for i in range(kh) for j in range(kw)]        # each [B,OH,OW,C]
    col = jnp.stack(patches, axis=3)                          # [B,OH,OW,kh*kw,C]
    col = col.reshape(b, oh, ow, kh * kw * c)                 # K in (KH,KW,C) order
    corners = []
    for ci in (0, 1):
        for cj in (0, 1):
            cc = col[:, ci::2, cj::2, :].reshape(b * ph * pw, kh * kw * c)
            corners.append(cc)
    corners = jnp.stack(corners, axis=0)                      # [4, B*PH*PW, K]
    k = kh * kw * c
    k_pad = _round_up(k, _K_ALIGN)
    if k_pad != k:
        corners = jnp.pad(corners, ((0, 0), (0, 0), (0, k_pad - k)))
    return corners, (b, ph, pw)


# ----------------------------------------------------------------------------
# Parameters
# ----------------------------------------------------------------------------
def init_params(key, num_classes=10, input_channels=1):
    """PyTorch-layout LeNet parameters (float32)."""
    ks = jax.random.split(key, 10)
    scale = 0.1
    w = lambda k, shape: scale * jax.random.normal(k, shape, dtype=jnp.float32)
    feat = 16 * 4 * 4 if input_channels == 1 else 16 * 5 * 5
    return {
        "conv1_w": w(ks[0], (6, input_channels, 5, 5)),
        "conv1_b": w(ks[1], (6,)),
        "conv2_w": w(ks[2], (16, 6, 5, 5)),
        "conv2_b": w(ks[3], (16,)),
        "fc1_w": w(ks[4], (120, feat)),      # PyTorch Linear: [out, in]
        "fc1_b": w(ks[5], (120,)),
        "fc2_w": w(ks[6], (84, 120)),
        "fc2_b": w(ks[7], (84,)),
        "fc3_w": w(ks[8], (num_classes, 84)),
        "fc3_b": w(ks[9], (num_classes,)),
    }


def prepare_params(params):
    """One-time conversion to kernel-ready layout.

    * conv weights -> [K, 128] bf16 with rows in (KH, KW, Cin) order (matches the
      NHWC im2col column order), K padded to a multiple of 16, Cout padded to 128.
    * fc1 weight rows scattered into a [PH*PW*128, 128] bf16 matrix so the conv2
      kernel output flows into the MLP via a plain contiguous reshape (the padded
      lanes hit zero weight rows).
    * fc2/fc3 -> [128, 128] bf16. Biases stay f32, padded to 128 lanes.
    """
    def pad_bias(bias):
        return jnp.pad(bias, (0, _LANE - bias.shape[0])).reshape(1, _LANE).astype(jnp.float32)

    def conv(wt, bias):
        cout, cin, kh, kw = wt.shape
        k = kh * kw * cin
        k_pad = _round_up(k, _K_ALIGN)
        w2d = wt.transpose(2, 3, 1, 0).reshape(k, cout)            # rows (KH,KW,Cin)
        w2d = jnp.pad(w2d, ((0, k_pad - k), (0, _LANE - cout))).astype(jnp.bfloat16)
        return w2d, pad_bias(bias)

    def fc(wt, bias, k_pad):
        nout, nin = wt.shape
        w2d = jnp.pad(wt.T, ((0, k_pad - nin), (0, _LANE - nout))).astype(jnp.bfloat16)
        return w2d, pad_bias(bias)

    c1w, c1b = conv(params["conv1_w"], params["conv1_b"])
    c2w, c2b = conv(params["conv2_w"], params["conv2_b"])

    # fc1: torch flattens NCHW as (C, PH, PW); the conv2 kernel output rows are
    # (B, PH, PW) with channels in lanes, so scatter the fc1 weight rows once
    # into (PH, PW, lane) order with zero rows for the padded lanes.
    f1 = params["fc1_w"]
    nout, nfeat = f1.shape
    c2out = params["conv2_w"].shape[0]
    assert nfeat % c2out == 0
    side2 = nfeat // c2out
    side = int(round(side2 ** 0.5))
    assert side * side == side2, "fc1 expects a square pooled map from conv2"
    f1_r = f1.reshape(nout, c2out, side, side)                     # (C, PH, PW) cols
    w1 = jnp.zeros((side, side, _LANE, nout), jnp.float32)
    w1 = w1.at[:, :, :c2out, :].set(f1_r.transpose(2, 3, 1, 0))    # (PH, PW, C, out)
    w1 = w1.reshape(side * side * _LANE, nout)
    f1w = jnp.pad(w1, ((0, 0), (0, _LANE - nout))).astype(jnp.bfloat16)
    f1b = pad_bias(params["fc1_b"])

    f2w, f2b = fc(params["fc2_w"], params["fc2_b"], k_pad=_LANE)   # 120 -> 128
    f3w, f3b = fc(params["fc3_w"], params["fc3_b"], k_pad=_LANE)   # 84  -> 128
    return {
        "conv1_w": c1w, "conv1_b": c1b,
        "conv2_w": c2w, "conv2_b": c2b,
        "fc1_w": f1w, "fc1_b": f1b,
        "fc2_w": f2w, "fc2_b": f2b,
        "fc3_w": f3w, "fc3_b": f3b,
    }


# ----------------------------------------------------------------------------
# Forward
# ----------------------------------------------------------------------------
def lenet_forward(prep, x, num_classes=10):
    """x: [B, Cin, H, W] NCHW f32 -> logits [B, num_classes]."""
    # NCHW f32 -> NHWC bf16 once (small raw input), so all im2col glue moves bf16.
    x = x.astype(jnp.bfloat16).transpose(0, 2, 3, 1)

    # conv1 + ReLU + 2x2 maxpool (fused kernel); output stays NHWC / bf16.
    c1, (b, ph, pw) = pool_corner_cols(x, 5, 5)
    h = conv_relu_pool(c1, prep["conv1_w"], prep["conv1_b"])        # [B*ph*pw, 128] bf16
    h = h[:, :_C1_OUT].reshape(b, ph, pw, _C1_OUT)                  # NHWC, no transpose

    # conv2 + ReLU + 2x2 maxpool (fused kernel).
    c2, (_, ph, pw) = pool_corner_cols(h, 5, 5)
    h = conv_relu_pool(c2, prep["conv2_w"], prep["conv2_b"])        # [B*ph*pw, 128] bf16

    # Flatten straight into the MLP: plain contiguous reshape (no lane slice,
    # no transpose) -- fc1 weight rows were pre-scattered to (ph, pw, lane).
    h = h.reshape(b, ph * pw * _LANE)

    # fc1+ReLU -> fc2+ReLU -> fc3 (single fused kernel).
    logits = mlp(h, prep["fc1_w"], prep["fc1_b"],
                 prep["fc2_w"], prep["fc2_b"],
                 prep["fc3_w"], prep["fc3_b"])
    return logits[:, :num_classes]


# ----------------------------------------------------------------------------
# Plain-JAX f32 reference (PyTorch semantics) for correctness checking
# ----------------------------------------------------------------------------
def lenet_reference(params, x):
    def conv(x, w, b):
        y = jax.lax.conv_general_dilated(
            x, w, (1, 1), "VALID", dimension_numbers=("NCHW", "OIHW", "NCHW"))
        return y + b.reshape(1, -1, 1, 1)

    def pool(x):
        return jax.lax.reduce_window(x, -jnp.inf, jax.lax.max,
                                     (1, 1, 2, 2), (1, 1, 2, 2), "VALID")

    h = pool(jax.nn.relu(conv(x, params["conv1_w"], params["conv1_b"])))
    h = pool(jax.nn.relu(conv(h, params["conv2_w"], params["conv2_b"])))
    h = h.reshape(h.shape[0], -1)
    h = jax.nn.relu(h @ params["fc1_w"].T + params["fc1_b"])
    h = jax.nn.relu(h @ params["fc2_w"].T + params["fc2_b"])
    return h @ params["fc3_w"].T + params["fc3_b"]


if __name__ == "__main__":
    key = jax.random.PRNGKey(0)
    k_params, k_x = jax.random.split(key)

    params = init_params(k_params, num_classes=10, input_channels=1)
    prep = prepare_params(params)                 # one-time weight prep, outside jit
    x = jax.random.normal(k_x, (2, 1, 28, 28), dtype=jnp.float32)  # MNIST-shaped batch

    logits = jax.jit(lenet_forward)(prep, x)
    logits = jax.block_until_ready(logits)

    assert logits.shape == (2, 10), logits.shape
    assert bool(jnp.all(jnp.isfinite(logits)))

    ref = lenet_reference(params, x)
    err = float(jnp.max(jnp.abs(logits - ref)))
    assert err < 1e-1, f"max |kernel - f32 reference| too large: {err}"

    print("KERNEL_OK")
</pallas_src>

<mosaic_0001>
module attributes {stable_mosaic.version = 11 : i64} {
  func.func @_conv_relu_pool_kernel(%arg0: i32, %arg1: memref<4x144x32xbf16, #tpu.memory_space<vmem>>, %arg2: memref<32x128xbf16, #tpu.memory_space<vmem>>, %arg3: memref<1x128xf32, #tpu.memory_space<vmem>>, %arg4: memref<144x128xbf16, #tpu.memory_space<vmem>>) attributes {dimension_semantics = [#tpu.dimension_semantics<parallel>], iteration_bounds = array<i64: 2>, scalar_prefetch = 0 : i64, scratch_operands = 0 : i64, tpu.core_type = #tpu.core_type<tc>, window_params = [{transform_indices = @transform_0, window_bounds = array<i64: 4, 144, 32>}, {pipeline_mode = #tpu.pipeline_mode<synchronous>, transform_indices = @transform_1, window_bounds = array<i64: 32, 128>}, {pipeline_mode = #tpu.pipeline_mode<synchronous>, transform_indices = @transform_2, window_bounds = array<i64: 1, 128>}, {transform_indices = @transform_3, window_bounds = array<i64: 144, 128>}]} {
    %c0 = arith.constant 0 : index
    %c0_0 = arith.constant 0 : index
    %c0_1 = arith.constant 0 : index
    %0 = vector.load %arg1[%c0, %c0_0, %c0_1] : memref<4x144x32xbf16, #tpu.memory_space<vmem>>, vector<4x144x32xbf16>
    %1 = vector.shape_cast %0 : vector<4x144x32xbf16> to vector<576x32xbf16>
    %c0_2 = arith.constant 0 : index
    %c0_3 = arith.constant 0 : index
    %2 = vector.load %arg2[%c0_2, %c0_3] : memref<32x128xbf16, #tpu.memory_space<vmem>>, vector<32x128xbf16>
    %cst = arith.constant dense<0.000000e+00> : vector<576x128xf32>
    %3 = tpu.matmul %1, %2, %cst {dimension_numbers = #tpu.dot_dimension_numbers<[1], [0], [0], [1], [0, 0, 1, 1], [], []>} : vector<576x32xbf16>, vector<32x128xbf16>, vector<576x128xf32> -> vector<576x128xf32>
    %4 = vector.shape_cast %3 : vector<576x128xf32> to vector<4x144x128xf32>
    %cst_4 = arith.constant dense<0xFF800000> : vector<144x128xf32>
    %5 = vector.multi_reduction <maximumf>, %4, %cst_4 [0] : vector<4x144x128xf32> to vector<144x128xf32>
    %c0_5 = arith.constant 0 : index
    %c0_6 = arith.constant 0 : index
    %6 = vector.load %arg3[%c0_5, %c0_6] : memref<1x128xf32, #tpu.memory_space<vmem>>, vector<1x128xf32>
    %7 = vector.broadcast %6 : vector<1x128xf32> to vector<144x128xf32>
    %8 = arith.addf %5, %7 : vector<144x128xf32>
    %cst_7 = arith.constant 0.000000e+00 : f32
    %9 = vector.broadcast %cst_7 : f32 to vector<144x128xf32>
    %10 = arith.maximumf %8, %9 : vector<144x128xf32>
    %11 = arith.truncf %10 : vector<144x128xf32> to vector<144x128xbf16>
    %c0_8 = arith.constant 0 : index
    %c0_9 = arith.constant 0 : index
    %12 = vector.load %arg4[%c0_8, %c0_9] : memref<144x128xbf16, #tpu.memory_space<vmem>>, vector<144x128xbf16>
    tpu.vector_store %arg4[%c0_8, %c0_9], %11 {strides = array<i32>} : memref<144x128xbf16, #tpu.memory_space<vmem>>, vector<144x128xbf16>,
    return
  }
  func.func @transform_0(%arg0: i32) -> (i32, i32, i32) {
    %c0_i32 = arith.constant 0 : i32
    %c0_i32_0 = arith.constant 0 : i32
    %c0_i32_1 = arith.constant 0 : i32
    return %c0_i32, %arg0, %c0_i32_0 : i32, i32, i32
  }
  func.func @transform_1(%arg0: i32) -> (i32, i32) {
    %c0_i32 = arith.constant 0 : i32
    %c0_i32_0 = arith.constant 0 : i32
    %c0_i32_1 = arith.constant 0 : i32
    return %c0_i32, %c0_i32_0 : i32, i32
  }
  func.func @transform_2(%arg0: i32) -> (i32, i32) {
    %c0_i32 = arith.constant 0 : i32
    %c0_i32_0 = arith.constant 0 : i32
    %c0_i32_1 = arith.constant 0 : i32
    return %c0_i32, %c0_i32_0 : i32, i32
  }
  func.func @transform_3(%arg0: i32) -> (i32, i32) {
    %c0_i32 = arith.constant 0 : i32
    %c0_i32_0 = arith.constant 0 : i32
    return %arg0, %c0_i32 : i32, i32
  }
}

module attributes {stable_mosaic.version = 11 : i64} {
  func.func @_mlp_kernel(%arg0: i32, %arg1: memref<16x2048xbf16, #tpu.memory_space<vmem>>, %arg2: memref<2048x128xbf16, #tpu.memory_space<vmem>>, %arg3: memref<1x128xf32, #tpu.memory_space<vmem>>, %arg4: memref<128x128xbf16, #tpu.memory_space<vmem>>, %arg5: memref<1x128xf32, #tpu.memory_space<vmem>>, %arg6: memref<128x128xbf16, #tpu.memory_space<vmem>>, %arg7: memref<1x128xf32, #tpu.memory_space<vmem>>, %arg8: memref<16x128xf32, #tpu.memory_space<vmem>>) attributes {dimension_semantics = [#tpu.dimension_semantics<parallel>], iteration_bounds = array<i64: 1>, scalar_prefetch = 0 : i64, scratch_operands = 0 : i64, tpu.core_type = #tpu.core_type<tc>, window_params = [{transform_indices = @transform_0, window_bounds = array<i64: 16, 2048>}, {pipeline_mode = #tpu.pipeline_mode<synchronous>, transform_indices = @transform_1, window_bounds = array<i64: 2048, 128>}, {pipeline_mode = #tpu.pipeline_mode<synchronous>, transform_indices = @transform_2, window_bounds = array<i64: 1, 128>}, {pipeline_mode = #tpu.pipeline_mode<synchronous>, transform_indices = @transform_3, window_bounds = array<i64: 128, 128>}, {pipeline_mode = #tpu.pipeline_mode<synchronous>, transform_indices = @transform_4, window_bounds = array<i64: 1, 128>}, {pipeline_mode = #tpu.pipeline_mode<synchronous>, transform_indices = @transform_5, window_bounds = array<i64: 128, 128>}, {pipeline_mode = #tpu.pipeline_mode<synchronous>, transform_indices = @transform_6, window_bounds = array<i64: 1, 128>}, {transform_indices = @transform_7, window_bounds = array<i64: 16, 128>}]} {
    %c0 = arith.constant 0 : index
    %c0_0 = arith.constant 0 : index
    %0 = vector.load %arg1[%c0, %c0_0] : memref<16x2048xbf16, #tpu.memory_space<vmem>>, vector<16x2048xbf16>
    %c0_1 = arith.constant 0 : index
    %c0_2 = arith.constant 0 : index
    %1 = vector.load %arg2[%c0_1, %c0_2] : memref<2048x128xbf16, #tpu.memory_space<vmem>>, vector<2048x128xbf16>
    %cst = arith.constant dense<0.000000e+00> : vector<16x128xf32>
    %2 = tpu.matmul %0, %1, %cst {dimension_numbers = #tpu.dot_dimension_numbers<[1], [0], [0], [1], [0, 0, 1, 1], [], []>} : vector<16x2048xbf16>, vector<2048x128xbf16>, vector<16x128xf32> -> vector<16x128xf32>
    %c0_3 = arith.constant 0 : index
    %c0_4 = arith.constant 0 : index
    %3 = vector.load %arg3[%c0_3, %c0_4] : memref<1x128xf32, #tpu.memory_space<vmem>>, vector<1x128xf32>
    %4 = vector.broadcast %3 : vector<1x128xf32> to vector<16x128xf32>
    %5 = arith.addf %2, %4 : vector<16x128xf32>
    %cst_5 = arith.constant 0.000000e+00 : f32
    %6 = vector.broadcast %cst_5 : f32 to vector<16x128xf32>
    %7 = arith.maximumf %5, %6 : vector<16x128xf32>
    %8 = arith.truncf %7 : vector<16x128xf32> to vector<16x128xbf16>
    %c0_6 = arith.constant 0 : index
    %c0_7 = arith.constant 0 : index
    %9 = vector.load %arg4[%c0_6, %c0_7] : memref<128x128xbf16, #tpu.memory_space<vmem>>, vector<128x128xbf16>
    %cst_8 = arith.constant dense<0.000000e+00> : vector<16x128xf32>
    %10 = tpu.matmul %8, %9, %cst_8 {dimension_numbers = #tpu.dot_dimension_numbers<[1], [0], [0], [1], [0, 0, 1, 1], [], []>} : vector<16x128xbf16>, vector<128x128xbf16>, vector<16x128xf32> -> vector<16x128xf32>
    %c0_9 = arith.constant 0 : index
    %c0_10 = arith.constant 0 : index
    %11 = vector.load %arg5[%c0_9, %c0_10] : memref<1x128xf32, #tpu.memory_space<vmem>>, vector<1x128xf32>
    %12 = vector.broadcast %11 : vector<1x128xf32> to vector<16x128xf32>
    %13 = arith.addf %10, %12 : vector<16x128xf32>
    %cst_11 = arith.constant 0.000000e+00 : f32
    %14 = vector.broadcast %cst_11 : f32 to vector<16x128xf32>
    %15 = arith.maximumf %13, %14 : vector<16x128xf32>
    %16 = arith.truncf %15 : vector<16x128xf32> to vector<16x128xbf16>
    %c0_12 = arith.constant 0 : index
    %c0_13 = arith.constant 0 : index
    %17 = vector.load %arg6[%c0_12, %c0_13] : memref<128x128xbf16, #tpu.memory_space<vmem>>, vector<128x128xbf16>
    %cst_14 = arith.constant dense<0.000000e+00> : vector<16x128xf32>
    %18 = tpu.matmul %16, %17, %cst_14 {dimension_numbers = #tpu.dot_dimension_numbers<[1], [0], [0], [1], [0, 0, 1, 1], [], []>} : vector<16x128xbf16>, vector<128x128xbf16>, vector<16x128xf32> -> vector<16x128xf32>
    %c0_15 = arith.constant 0 : index
    %c0_16 = arith.constant 0 : index
    %19 = vector.load %arg7[%c0_15, %c0_16] : memref<1x128xf32, #tpu.memory_space<vmem>>, vector<1x128xf32>
    %20 = vector.broadcast %19 : vector<1x128xf32> to vector<16x128xf32>
    %21 = arith.addf %18, %20 : vector<16x128xf32>
    %c0_17 = arith.constant 0 : index
    %c0_18 = arith.constant 0 : index
    %22 = vector.load %arg8[%c0_17, %c0_18] : memref<16x128xf32, #tpu.memory_space<vmem>>, vector<16x128xf32>
    tpu.vector_store %arg8[%c0_17, %c0_18], %21 {strides = array<i32>} : memref<16x128xf32, #tpu.memory_space<vmem>>, vector<16x128xf32>,
    return
  }
  func.func @transform_0(%arg0: i32) -> (i32, i32) {
    %c0_i32 = arith.constant 0 : i32
    %c0_i32_0 = arith.constant 0 : i32
    return %arg0, %c0_i32 : i32, i32
  }
  func.func @transform_1(%arg0: i32) -> (i32, i32) {
    %c0_i32 = arith.constant 0 : i32
    %c0_i32_0 = arith.constant 0 : i32
    %c0_i32_1 = arith.constant 0 : i32
    return %c0_i32, %c0_i32_0 : i32, i32
  }
  func.func @transform_2(%arg0: i32) -> (i32, i32) {
    %c0_i32 = arith.constant 0 : i32
    %c0_i32_0 = arith.constant 0 : i32
    %c0_i32_1 = arith.constant 0 : i32
    return %c0_i32, %c0_i32_0 : i32, i32
  }
  func.func @transform_3(%arg0: i32) -> (i32, i32) {
    %c0_i32 = arith.constant 0 : i32
    %c0_i32_0 = arith.constant 0 : i32
    %c0_i32_1 = arith.constant 0 : i32
    return %c0_i32, %c0_i32_0 : i32, i32
  }
  func.func @transform_4(%arg0: i32) -> (i32, i32) {
    %c0_i32 = arith.constant 0 : i32
    %c0_i32_0 = arith.constant 0 : i32
    %c0_i32_1 = arith.constant 0 : i32
    return %c0_i32, %c0_i32_0 : i32, i32
  }
  func.func @transform_5(%arg0: i32) -> (i32, i32) {
    %c0_i32 = arith.constant 0 : i32
    %c0_i32_0 = arith.constant 0 : i32
    %c0_i32_1 = arith.constant 0 : i32
    return %c0_i32, %c0_i32_0 : i32, i32
  }
  func.func @transform_6(%arg0: i32) -> (i32, i32) {
    %c0_i32 = arith.constant 0 : i32
    %c0_i32_0 = arith.constant 0 : i32
    %c0_i32_1 = arith.constant 0 : i32
    return %c0_i32, %c0_i32_0 : i32, i32
  }
  func.func @transform_7(%arg0: i32) -> (i32, i32) {
    %c0_i32 = arith.constant 0 : i32
    %c0_i32_0 = arith.constant 0 : i32
    return %arg0, %c0_i32 : i32, i32
  }
}

module attributes {stable_mosaic.version = 11 : i64} {
  func.func @_conv_relu_pool_kernel(%arg0: i32, %arg1: memref<4x16x160xbf16, #tpu.memory_space<vmem>>, %arg2: memref<160x128xbf16, #tpu.memory_space<vmem>>, %arg3: memref<1x128xf32, #tpu.memory_space<vmem>>, %arg4: memref<16x128xbf16, #tpu.memory_space<vmem>>) attributes {dimension_semantics = [#tpu.dimension_semantics<parallel>], iteration_bounds = array<i64: 2>, scalar_prefetch = 0 : i64, scratch_operands = 0 : i64, tpu.core_type = #tpu.core_type<tc>, window_params = [{transform_indices = @transform_0, window_bounds = array<i64: 4, 16, 160>}, {pipeline_mode = #tpu.pipeline_mode<synchronous>, transform_indices = @transform_1, window_bounds = array<i64: 160, 128>}, {pipeline_mode = #tpu.pipeline_mode<synchronous>, transform_indices = @transform_2, window_bounds = array<i64: 1, 128>}, {transform_indices = @transform_3, window_bounds = array<i64: 16, 128>}]} {
    %c0 = arith.constant 0 : index
    %c0_0 = arith.constant 0 : index
    %c0_1 = arith.constant 0 : index
    %0 = vector.load %arg1[%c0, %c0_0, %c0_1] : memref<4x16x160xbf16, #tpu.memory_space<vmem>>, vector<4x16x160xbf16>
    %1 = vector.shape_cast %0 : vector<4x16x160xbf16> to vector<64x160xbf16>
    %c0_2 = arith.constant 0 : index
    %c0_3 = arith.constant 0 : index
    %2 = vector.load %arg2[%c0_2, %c0_3] : memref<160x128xbf16, #tpu.memory_space<vmem>>, vector<160x128xbf16>
    %cst = arith.constant dense<0.000000e+00> : vector<64x128xf32>
    %3 = tpu.matmul %1, %2, %cst {dimension_numbers = #tpu.dot_dimension_numbers<[1], [0], [0], [1], [0, 0, 1, 1], [], []>} : vector<64x160xbf16>, vector<160x128xbf16>, vector<64x128xf32> -> vector<64x128xf32>
    %4 = vector.shape_cast %3 : vector<64x128xf32> to vector<4x16x128xf32>
    %cst_4 = arith.constant dense<0xFF800000> : vector<16x128xf32>
    %5 = vector.multi_reduction <maximumf>, %4, %cst_4 [0] : vector<4x16x128xf32> to vector<16x128xf32>
    %c0_5 = arith.constant 0 : index
    %c0_6 = arith.constant 0 : index
    %6 = vector.load %arg3[%c0_5, %c0_6] : memref<1x128xf32, #tpu.memory_space<vmem>>, vector<1x128xf32>
    %7 = vector.broadcast %6 : vector<1x128xf32> to vector<16x128xf32>
    %8 = arith.addf %5, %7 : vector<16x128xf32>
    %cst_7 = arith.constant 0.000000e+00 : f32
    %9 = vector.broadcast %cst_7 : f32 to vector<16x128xf32>
    %10 = arith.maximumf %8, %9 : vector<16x128xf32>
    %11 = arith.truncf %10 : vector<16x128xf32> to vector<16x128xbf16>
    %c0_8 = arith.constant 0 : index
    %c0_9 = arith.constant 0 : index
    %12 = vector.load %arg4[%c0_8, %c0_9] : memref<16x128xbf16, #tpu.memory_space<vmem>>, vector<16x128xbf16>
    tpu.vector_store %arg4[%c0_8, %c0_9], %11 {strides = array<i32>} : memref<16x128xbf16, #tpu.memory_space<vmem>>, vector<16x128xbf16>,
    return
  }
  func.func @transform_0(%arg0: i32) -> (i32, i32, i32) {
    %c0_i32 = arith.constant 0 : i32
    %c0_i32_0 = arith.constant 0 : i32
    %c0_i32_1 = arith.constant 0 : i32
    return %c0_i32, %arg0, %c0_i32_0 : i32, i32, i32
  }
  func.func @transform_1(%arg0: i32) -> (i32, i32) {
    %c0_i32 = arith.constant 0 : i32
    %c0_i32_0 = arith.constant 0 : i32
    %c0_i32_1 = arith.constant 0 : i32
    return %c0_i32, %c0_i32_0 : i32, i32
  }
  func.func @transform_2(%arg0: i32) -> (i32, i32) {
    %c0_i32 = arith.constant 0 : i32
    %c0_i32_0 = arith.constant 0 : i32
    %c0_i32_1 = arith.constant 0 : i32
    return %c0_i32, %c0_i32_0 : i32, i32
  }
  func.func @transform_3(%arg0: i32) -> (i32, i32) {
    %c0_i32 = arith.constant 0 : i32
    %c0_i32_0 = arith.constant 0 : i32
    return %arg0, %c0_i32 : i32, i32
  }
}

</mosaic_0001>

<bundles_post_ra>
// kernel: lenet_forward.3
= control target key start
LH: loop header
LB: loop body
LE: loop exit
PB: predicated region body
PF: predicated region fallthrough
CT: control target
= control target key end

     0   :  { %s1847_s12 = smov 0   ;;  %s1849_s13 = smov 0   ;;  %s2173_s0 = inlined_call_operand.vmem [shape: bf16[4,288,32], index: 0, kind: input, shape index: {}]   ;;  %s2174_s1 = inlined_call_operand.vmem [shape: bf16[32,128], index: 1, kind: input, shape index: {}]   ;;  %s2175_s2 = inlined_call_operand.vmem [shape: f32[1,128], index: 2, kind: input, shape index: {}]   ;;  %s2176_s3 = inlined_call_operand.vmem [shape: bf16[288,128], index: 3, kind: output, shape index: {}]  }
   0x1   :  { %s1851_s14 = smov 0  }
   0x2 LB: > { %s1447_s15 = sadd.s32 4294967295, %s1825_s14   ;;  %s1864_s16 = sadd.s32 1, %s1825_s14   ;;  %s1825_s14 = sphi %s1851_s14, %s2179_s14   ;;  %s1821_s13 = sphi %s1849_s13, %s2178_s13   ;;  %s1817_s12 = sphi %s1847_s12, %s2177_s12  }
   0x3   : > { %s17_s17 = ssub.s32 %s1825_s14, %s1864_s16  ;;  %s20_s18 = sadd.s32 1, %s1821_s13 }
   0x4   : > { %p18_p0 = scmp.eq.s32.totalorder %s17_s17, 0  ;;  %p27_p1 = scmp.ne.s32.totalorder %s1821_s13, %s1817_s12 }
   0x5   : > { %p28_p2 = scmp.eq.s32.totalorder %s1825_s14, 0  ;;  %p1450_p4 = scmp.ge.s32.totalorder %s1825_s14, 2 }
   0x6   : > { %s1873_s19 = scalar_select %p18_p0, %s1821_s13, %s20_s18  }
   0x7   : > { %p29_p3 = por %p28_p2, %p27_p1  ;;  %127 = sbr.rel (%p1450_p4) target bundleno = 37 (0x25), region = 24 }
   0xe   : > { %130 = sbr.rel (!%p29_p3) target bundleno = 37 (0x25), region = 28  ;;  %s132_s20 = sand.u32 (%p29_p3), 1, %s1821_s13  }
   0xf   : > { %s1549_s21 = smul.u32 (%p29_p3), 72, %s1825_s14 }
  0x10   : > { %s1739_s22 = smul.u32 (%p29_p3), 288, %s132_s20 }
  0x11   : > { %s1881_s25 = scalar_lea.vmem (%p29_p3), %s2173_s0, %s1549_s21 }
  0x12   : > { %v153_v0 = vld [vmem:[%s1881_s25] sm:$0xff] (%p29_p3)   ;;  %v157_v1 = vld [vmem:[%s1881_s25 + $0x8] sm:$0xff] (%p29_p3)   ;;  %v161_v2 = vld [vmem:[%s1881_s25 + $0x10] sm:$0xff] (%p29_p3)   ;;  %s1886_s26 = scalar_lea.vmem (%p29_p3), [#allocation2], %s1739_s22 }
  0x13   : > { %154 = vst [vmem:[%s1886_s26] sm:$0xff] (%p29_p3), %v153_v0   ;;  %158 = vst [vmem:[%s1886_s26 + $0x8] sm:$0xff] (%p29_p3), %v157_v1   ;;  %v165_v3 = vld [vmem:[%s1881_s25 + $0x18] sm:$0xff] (%p29_p3)   ;;  %v169_v4 = vld [vmem:[%s1881_s25 + $0x20] sm:$0xff] (%p29_p3)  }
  0x14   : > { %162 = vst [vmem:[%s1886_s26 + $0x10] sm:$0xff] (%p29_p3), %v161_v2   ;;  %v173_v5 = vld [vmem:[%s1881_s25 + $0x28] sm:$0xff] (%p29_p3)   ;;  %166 = vst [vmem:[%s1886_s26 + $0x18] sm:$0xff] (%p29_p3), %v165_v3   ;;  %v177_v6 = vld [vmem:[%s1881_s25 + $0x30] sm:$0xff] (%p29_p3)  }
  0x15   : > { %170 = vst [vmem:[%s1886_s26 + $0x20] sm:$0xff] %v169_v4   ;;  %174 = vst [vmem:[%s1886_s26 + $0x28] sm:$0xff] %v173_v5   ;;  %v181_v7 = vld [vmem:[%s1881_s25 + $0x38] sm:$0xff]   ;;  %v185_v8 = vld [vmem:[%s1881_s25 + $0x40] sm:$0xff]  }
  0x16   : > { %178 = vst [vmem:[%s1886_s26 + $0x30] sm:$0xff] %v177_v6   ;;  %182 = vst [vmem:[%s1886_s26 + $0x38] sm:$0xff] %v181_v7   ;;  %v189_v9 = vld [vmem:[%s1881_s25 + $0x90] sm:$0xff]   ;;  %v193_v10 = vld [vmem:[%s1881_s25 + $0x98] sm:$0xff]  }
  0x17   : > { %186 = vst [vmem:[%s1886_s26 + $0x40] sm:$0xff] %v185_v8   ;;  %v197_v11 = vld [vmem:[%s1881_s25 + $0xa0] sm:$0xff]   ;;  %190 = vst [vmem:[%s1886_s26 + $0x48] sm:$0xff] %v189_v9   ;;  %v201_v12 = vld [vmem:[%s1881_s25 + $0xa8] sm:$0xff]  }
  0x18   : > { %194 = vst [vmem:[%s1886_s26 + $0x50] sm:$0xff] %v193_v10   ;;  %198 = vst [vmem:[%s1886_s26 + $0x58] sm:$0xff] %v197_v11   ;;  %v205_v13 = vld [vmem:[%s1881_s25 + $0xb0] sm:$0xff]   ;;  %v209_v14 = vld [vmem:[%s1881_s25 + $0xb8] sm:$0xff]  }
  0x19   : > { %202 = vst [vmem:[%s1886_s26 + $0x60] sm:$0xff] %v201_v12   ;;  %206 = vst [vmem:[%s1886_s26 + $0x68] sm:$0xff] %v205_v13   ;;  %v213_v15 = vld [vmem:[%s1881_s25 + $0xc0] sm:$0xff]   ;;  %v217_v16 = vld [vmem:[%s1881_s25 + $0xc8] sm:$0xff]  }
  0x1a   : > { %210 = vst [vmem:[%s1886_s26 + $0x70] sm:$0xff] %v209_v14   ;;  %v221_v17 = vld [vmem:[%s1881_s25 + $0xd0] sm:$0xff]   ;;  %214 = vst [vmem:[%s1886_s26 + $0x78] sm:$0xff] %v213_v15   ;;  %v225_v18 = vld [vmem:[%s1881_s25 + $0x120] sm:$0xff]  }
  0x1b   : > { %218 = vst [vmem:[%s1886_s26 + $0x80] sm:$0xff] %v217_v16   ;;  %222 = vst [vmem:[%s1886_s26 + $0x88] sm:$0xff] %v221_v17   ;;  %v229_v19 = vld [vmem:[%s1881_s25 + $0x128] sm:$0xff]   ;;  %v233_v20 = vld [vmem:[%s1881_s25 + $0x130] sm:$0xff]  }
  0x1c   : > { %226 = vst [vmem:[%s1886_s26 + $0x90] sm:$0xff] %v225_v18   ;;  %230 = vst [vmem:[%s1886_s26 + $0x98] sm:$0xff] %v229_v19   ;;  %v237_v21 = vld [vmem:[%s1881_s25 + $0x138] sm:$0xff]   ;;  %v241_v22 = vld [vmem:[%s1881_s25 + $0x140] sm:$0xff]  }
  0x1d   : > { %234 = vst [vmem:[%s1886_s26 + $0xa0] sm:$0xff] %v233_v20   ;;  %v245_v23 = vld [vmem:[%s1881_s25 + $0x148] sm:$0xff]   ;;  %238 = vst [vmem:[%s1886_s26 + $0xa8] sm:$0xff] %v237_v21   ;;  %v249_v24 = vld [vmem:[%s1881_s25 + $0x150] sm:$0xff]  }
  0x1e   : > { %242 = vst [vmem:[%s1886_s26 + $0xb0] sm:$0xff] %v241_v22   ;;  %246 = vst [vmem:[%s1886_s26 + $0xb8] sm:$0xff] %v245_v23   ;;  %v253_v25 = vld [vmem:[%s1881_s25 + $0x158] sm:$0xff]   ;;  %v257_v26 = vld [vmem:[%s1881_s25 + $0x160] sm:$0xff]  }
  0x1f   : > { %250 = vst [vmem:[%s1886_s26 + $0xc0] sm:$0xff] %v249_v24   ;;  %254 = vst [vmem:[%s1886_s26 + $0xc8] sm:$0xff] %v253_v25   ;;  %v261_v27 = vld [vmem:[%s1881_s25 + $0x1b0] sm:$0xff]   ;;  %v265_v28 = vld [vmem:[%s1881_s25 + $0x1b8] sm:$0xff]  }
  0x20   : > { %258 = vst [vmem:[%s1886_s26 + $0xd0] sm:$0xff] %v257_v26   ;;  %v269_v29 = vld [vmem:[%s1881_s25 + $0x1c0] sm:$0xff]   ;;  %262 = vst [vmem:[%s1886_s26 + $0xd8] sm:$0xff] %v261_v27   ;;  %v273_v30 = vld [vmem:[%s1881_s25 + $0x1c8] sm:$0xff]  }
  0x21   : > { %266 = vst [vmem:[%s1886_s26 + $0xe0] sm:$0xff] %v265_v28   ;;  %270 = vst [vmem:[%s1886_s26 + $0xe8] sm:$0xff] %v269_v29   ;;  %v277_v31 = vld [vmem:[%s1881_s25 + $0x1d0] sm:$0xff]   ;;  %v281_v32 = vld [vmem:[%s1881_s25 + $0x1d8] sm:$0xff]  }
  0x22   : > { %274 = vst [vmem:[%s1886_s26 + $0xf0] sm:$0xff] %v273_v30   ;;  %278 = vst [vmem:[%s1886_s26 + $0xf8] sm:$0xff] %v277_v31   ;;  %v285_v33 = vld [vmem:[%s1881_s25 + $0x1e0] sm:$0xff]   ;;  %v289_v34 = vld [vmem:[%s1881_s25 + $0x1e8] sm:$0xff]  }
  0x23   : > { %282 = vst [vmem:[%s1886_s26 + $0x100] sm:$0xff] %v281_v32   ;;  %v293_v35 = vld [vmem:[%s1881_s25 + $0x1f0] sm:$0xff]   ;;  %286 = vst [vmem:[%s1886_s26 + $0x108] sm:$0xff] %v285_v33  }
  0x24   : > { %290 = vst [vmem:[%s1886_s26 + $0x110] sm:$0xff] %v289_v34   ;;  %294 = vst [vmem:[%s1886_s26 + $0x118] sm:$0xff] %v293_v35  }
  0x25 PF: > { %p1452_p5 = scmp.ge.s32.totalorder %s1825_s14, 1  ;;  %p462_p6 = scmp.lt.s32.totalorder %s1825_s14, 3 }
  0x27   : > { %p463_p7 = pnand %p1452_p5, %p462_p6 }
  0x28   : > { %v1765_v36 = vld [vmem:[%s2174_s1] sm:$0xff] (!%p463_p7)   ;;  %s469_s29 = sand.u32 (!%p463_p7), 1, %s1817_s12   ;;  %v1766_v37 = vld [vmem:[%s2174_s1 + $0x8] sm:$0xff] (!%p463_p7)   ;;  %vm768_vm0 = vcmask (!%p463_p7), 261120   ;;  %s493_s7 = smul.u32 (!%p463_p7), 18, %s1447_s15 }
  0x29   : > { %466 = sbr.rel (%p463_p7) target bundleno = 341 (0x155), region = 69  ;;  %1659 = vmatprep.subr.bf16.mxu0 (!%p463_p7), %v1765_v36  ;;  %1735 = vmatprep.subr.bf16.mxu1 (!%p463_p7), %v1765_v36 }
  0x2a   : > { %s1740_s5 = smul.u32 (!%p463_p7), 288, %s469_s29  ;;  %1660 = vmatpush3.bf16.msra.mxu0 (!%p463_p7), %v1765_v36  ;;  %1737 = vmatpush3.bf16.msra.mxu1 (!%p463_p7), %v1765_v36  ;;  %p494_p8 = scmp.lt.s32.totalorder (!%p463_p7), %s493_s7, 35 }
  0x2b   : > { %1661 = vmatprep.subr.bf16.mxu0 (!%p463_p7), %v1766_v37  ;;  %1736 = vmatprep.subr.bf16.mxu1 (!%p463_p7), %v1766_v37 }
  0x2c   : > { %s1966_s6 = scalar_lea.vmem (!%p463_p7), [#allocation2], %s1740_s5 }
  0x2d   : > { %v1767_v38 = vld [vmem:[%s1966_s6] sm:$0xff] (!%p463_p7)   ;;  %v1768_v39 = vld [vmem:[%s1966_s6 + $0x8] sm:$0xff] (!%p463_p7)   ;;  %v1769_v40 = vld [vmem:[%s1966_s6 + $0x90] sm:$0xff] (!%p463_p7)  }
  0x2e   : > { %1663 = vmatprep.mubr.msk.bf16.mxu0 (!%p463_p7), %vm768_vm0, %v1767_v38  ;;  %1662 = vmatpush3.bf16.msra.mxu0 (!%p463_p7), %v1766_v37  ;;  %v1770_v41 = vld [vmem:[%s1966_s6 + $0x98] sm:$0xff] (!%p463_p7)   ;;  %v1771_v42 = vld [vmem:[%s1966_s6 + $0x10] sm:$0xff] (!%p463_p7)   ;;  %v1773_v43 = vld [vmem:[%s1966_s6 + $0xa0] sm:$0xff] (!%p463_p7)  }
  0x2f   : > { %1738 = vmatpush3.bf16.msra.mxu1 (!%p463_p7), %v1766_v37  ;;  %1699 = vmatprep.mubr.msk.bf16.mxu1 (!%p463_p7), %vm768_vm0, %v1769_v40  ;;  %v1772_v44 = vld [vmem:[%s1966_s6 + $0x18] sm:$0xff] (!%p463_p7)   ;;  %v1774_v45 = vld [vmem:[%s1966_s6 + $0xa8] sm:$0xff] (!%p463_p7)   ;;  %v1775_v46 = vld [vmem:[%s1966_s6 + $0x20] sm:$0xff] (!%p463_p7)  }
  0x30   : > { %v1777_v47 = vld [vmem:[%s1966_s6 + $0xb0] sm:$0xff]   ;;  %v1776_v48 = vld [vmem:[%s1966_s6 + $0x28] sm:$0xff]   ;;  %v1778_v49 = vld [vmem:[%s1966_s6 + $0xb8] sm:$0xff]   ;;  %s2181_s7 = smov (!%p494_p8, %s493_s7), 35 }
  0x31   : > { %1664 = vmatmul.mubr.msk.bf16.vlgmr.msra.gmra.mrb[0].mxu0 %vm768_vm0, %v1768_v39  ;;  %v1779_v50 = vld [vmem:[%s1966_s6 + $0x30] sm:$0xff]   ;;  %v1781_v51 = vld [vmem:[%s1966_s6 + $0xc0] sm:$0xff]   ;;  %v1780_v52 = vld [vmem:[%s1966_s6 + $0x38] sm:$0xff]   ;;  %s1453_s10 = sshll.u32 %s2181_s7, 2 }
  0x32   : > { %1700 = vmatmul.mubr.msk.bf16.vlgmr.msra.gmra.mrb[0].mxu1 %vm768_vm0, %v1770_v41  ;;  %1667 = vmatprep.mubr.msk.bf16.mxu0 %vm768_vm0, %v1771_v42  ;;  %v1782_v53 = vld [vmem:[%s1966_s6 + $0xc8] sm:$0xff]   ;;  %v1783_v54 = vld [vmem:[%s1966_s6 + $0x40] sm:$0xff]   ;;  %v1785_v55 = vld [vmem:[%s1966_s6 + $0xd0] sm:$0xff]   ;;  %s2109_s14 = scalar_lea.vmem %s2176_s3, %s1453_s10 }
  0x33   : > { %1703 = vmatprep.mubr.msk.bf16.mxu1 %vm768_vm0, %v1773_v43  ;;  %v1784_v56 = vld [vmem:[%s1966_s6 + $0x48] sm:$0xff]   ;;  %v1786_v57 = vld [vmem:[%s1966_s6 + $0xd8] sm:$0xff]   ;;  %v1787_v58 = vld [vmem:[%s1966_s6 + $0x50] sm:$0xff]  }
  0x34   : > { %v1789_v59 = vld [vmem:[%s1966_s6 + $0xe0] sm:$0xff]   ;;  %v1788_v60 = vld [vmem:[%s1966_s6 + $0x58] sm:$0xff]   ;;  %v1790_v61 = vld [vmem:[%s1966_s6 + $0xe8] sm:$0xff]  }
  0x35   : > { %v1791_v62 = vld [vmem:[%s1966_s6 + $0x60] sm:$0xff]   ;;  %v1793_v63 = vld [vmem:[%s1966_s6 + $0xf0] sm:$0xff]   ;;  %v1792_v0 = vld [vmem:[%s1966_s6 + $0x68] sm:$0xff]  }
  0x36   : > { %v1794_v1 = vld [vmem:[%s1966_s6 + $0xf8] sm:$0xff]   ;;  %v1795_v2 = vld [vmem:[%s1966_s6 + $0x70] sm:$0xff]   ;;  %v1797_v3 = vld [vmem:[%s1966_s6 + $0x100] sm:$0xff]  }
  0x37   : > { %v1796_v4 = vld [vmem:[%s1966_s6 + $0x78] sm:$0xff]   ;;  %v1798_v5 = vld [vmem:[%s1966_s6 + $0x108] sm:$0xff]   ;;  %v1799_v6 = vld [vmem:[%s1966_s6 + $0x80] sm:$0xff]  }
  0x38   : > { %v1801_v7 = vld [vmem:[%s1966_s6 + $0x110] sm:$0xff]   ;;  %v1800_v8 = vld [vmem:[%s1966_s6 + $0x88] sm:$0xff]   ;;  %v1802_v9 = vld [vmem:[%s1966_s6 + $0x118] sm:$0xff]  }
  0x39   : > { %1668 = vmatmul.mubr.msk.bf16.gmra.mrb[4].mxu0 %vm768_vm0, %v1772_v44 }
  0x3a   : > { %1704 = vmatmul.mubr.msk.bf16.gmra.mrb[4].mxu1 %vm768_vm0, %v1774_v45  ;;  %1671 = vmatprep.mubr.msk.bf16.mxu0 %vm768_vm0, %v1775_v46 }
  0x3b   : > { %1707 = vmatprep.mubr.msk.bf16.mxu1 %vm768_vm0, %v1777_v47 }
  0x41   : > { %1672 = vmatmul.mubr.msk.bf16.gmra.mrb[8].mxu0 %vm768_vm0, %v1776_v48 }
  0x42   : > { %1708 = vmatmul.mubr.msk.bf16.gmra.mrb[8].mxu1 %vm768_vm0, %v1778_v49  ;;  %1675 = vmatprep.mubr.msk.bf16.mxu0 %vm768_vm0, %v1779_v50 }
  0x43   : > { %1711 = vmatprep.mubr.msk.bf16.mxu1 %vm768_vm0, %v1781_v51 }
  0x49   : > { %1676 = vmatmul.mubr.msk.bf16.gmra.mrb[12].mxu0 %vm768_vm0, %v1780_v52 }
  0x4a   : > { %1712 = vmatmul.mubr.msk.bf16.gmra.mrb[12].mxu1 %vm768_vm0, %v1782_v53  ;;  %1679 = vmatprep.mubr.msk.bf16.mxu0 %vm768_vm0, %v1783_v54  ;;  %v2101_v53 = vld [vmem:[%s2175_s2] ss:$0 sm:$0xff] }
  0x4b   : > { %1715 = vmatprep.mubr.msk.bf16.mxu1 %vm768_vm0, %v1785_v55 }
  0x51   : > { %1680 = vmatmul.mubr.msk.bf16.gmra.mrb[16].mxu0 %vm768_vm0, %v1784_v56 }
  0x52   : > { %1716 = vmatmul.mubr.msk.bf16.gmra.mrb[16].mxu1 %vm768_vm0, %v1786_v57  ;;  %1683 = vmatprep.mubr.msk.bf16.mxu0 %vm768_vm0, %v1787_v58 }
  0x53   : > { %1719 = vmatprep.mubr.msk.bf16.mxu1 %vm768_vm0, %v1789_v59 }
  0x59   : > { %1684 = vmatmul.mubr.msk.bf16.gmra.mrb[20].mxu0 %vm768_vm0, %v1788_v60 }
  0x5a   : > { %1720 = vmatmul.mubr.msk.bf16.gmra.mrb[20].mxu1 %vm768_vm0, %v1790_v61  ;;  %1687 = vmatprep.mubr.msk.bf16.mxu0 %vm768_vm0, %v1791_v62 }
  0x5b   : > { %1723 = vmatprep.mubr.msk.bf16.mxu1 %vm768_vm0, %v1793_v63 }
  0x61   : > { %1688 = vmatmul.mubr.msk.bf16.gmra.mrb[24].mxu0 %vm768_vm0, %v1792_v0 }
  0x62   : > { %1724 = vmatmul.mubr.msk.bf16.gmra.mrb[24].mxu1 %vm768_vm0, %v1794_v1  ;;  %1691 = vmatprep.mubr.msk.bf16.mxu0 %vm768_vm0, %v1795_v2 }
  0x63   : > { %1727 = vmatprep.mubr.msk.bf16.mxu1 %vm768_vm0, %v1797_v3 }
  0x69   : > { %1692 = vmatmul.mubr.msk.bf16.gmra.mrb[28].mxu0 %vm768_vm0, %v1796_v4 }
  0x6a   : > { %1728 = vmatmul.mubr.msk.bf16.gmra.mrb[28].mxu1 %vm768_vm0, %v1798_v5  ;;  %1695 = vmatprep.mubr.msk.bf16.mxu0 %vm768_vm0, %v1799_v6 }
  0x6b   : > { %1731 = vmatprep.mubr.msk.bf16.mxu1 %vm768_vm0, %v1801_v7 }
  0x71   : > { %1696 = vmatmul.mubr.msk.bf16.gmra.mrb[32].mxu0 %vm768_vm0, %v1800_v8 }
  0x72   : > { %1732 = vmatmul.mubr.msk.bf16.gmra.mrb[32].mxu1 %vm768_vm0, %v1802_v9 }
 0x104   : > { %v2040_v10 = vpop.f32.mrb[0].mxu0 }
 0x105   : > { %v2042_v11 = vpop.f32.mrb[0].mxu1  ;;  %v911_v12 = vpop.f32.mrb[1].mxu0 }
 0x106   : > { %v1055_v13 = vpop.f32.mrb[1].mxu1  ;;  %v2044_v14 = vpop.f32.mrb[2].mxu0 }
 0x107   : > { %v2046_v15 = vpop.f32.mrb[2].mxu1  ;;  %v914_v16 = vpop.f32.mrb[3].mxu0 }
 0x108   : > { %v1058_v17 = vpop.f32.mrb[3].mxu1 }
 0x10c   : > { %v2048_v18 = vpop.f32.mrb[4].mxu0 }
 0x10d   : > { %v2050_v19 = vpop.f32.mrb[4].mxu1  ;;  %v927_v20 = vpop.f32.mrb[5].mxu0 }
 0x10e   : > { %v1071_v21 = vpop.f32.mrb[5].mxu1  ;;  %v2052_v22 = vpop.f32.mrb[6].mxu0 }
 0x10f   : > { %v2054_v23 = vpop.f32.mrb[6].mxu1  ;;  %v930_v24 = vpop.f32.mrb[7].mxu0 }
 0x110   : > { %v1074_v25 = vpop.f32.mrb[7].mxu1 }
 0x114   : > { %v2056_v26 = vpop.f32.mrb[8].mxu0 }
 0x115   : > { %v2058_v27 = vpop.f32.mrb[8].mxu1  ;;  %v2060_v28 = vpop.f32.mrb[9].mxu0 }
 0x116   : > { %v2062_v29 = vpop.f32.mrb[9].mxu1  ;;  %v2064_v30 = vpop.f32.mrb[10].mxu0 }
 0x117   : > { %v2066_v31 = vpop.f32.mrb[10].mxu1  ;;  %v2068_v32 = vpop.f32.mrb[11].mxu0 }
 0x118   : > { %v2070_v33 = vpop.f32.mrb[11].mxu1 }
 0x11c   : > { %v2072_v34 = vpop.f32.mrb[12].mxu0 }
 0x11d   : > { %v2074_v35 = vpop.f32.mrb[12].mxu1  ;;  %v2076_v36 = vpop.f32.mrb[13].mxu0 }
 0x11e   : > { %v2078_v37 = vpop.f32.mrb[13].mxu1  ;;  %v2080_v38 = vpop.f32.mrb[14].mxu0 }
 0x11f   : > { %v2082_v39 = vpop.f32.mrb[14].mxu1  ;;  %v2084_v40 = vpop.f32.mrb[15].mxu0 }
 0x120   : > { %v2086_v41 = vpop.f32.mrb[15].mxu1 }
 0x124   : > { %v1681_v42 = vpop.f32.mrb[16].mxu0 }
 0x125   : > { %v1717_v43 = vpop.f32.mrb[16].mxu1  ;;  %v1198_v44 = vmax.f32 %v911_v12, %v1681_v42  ;;  %v2090_v45 = vpop.f32.mrb[17].mxu0 }
 0x126   : > { %v2092_v46 = vpop.f32.mrb[17].mxu1  ;;  %v1682_v47 = vpop.f32.mrb[18].mxu0 }
 0x127   : > { %v1718_v48 = vpop.f32.mrb[18].mxu1  ;;  %v1199_v49 = vmax.f32 %v1198_v44, %v1055_v13  ;;  %v1201_v50 = vmax.f32 %v914_v16, %v1682_v47  ;;  %v2094_v51 = vpop.f32.mrb[19].mxu0 }
 0x128   : > { %v2096_v52 = vpop.f32.mrb[19].mxu1 }
 0x129   : > { %v1200_v54 = vmax.f32 %v1199_v49, %v1717_v43  ;;  %v1202_v55 = vmax.f32 %v1201_v50, %v1058_v17 }
 0x12b   : > { %v1259_v56 = vadd.f32 %v2101_v53, %v1200_v54  ;;  %v1203_v57 = vmax.f32 %v1202_v55, %v1718_v48 }
 0x12c   : > { %v1685_v58 = vpop.f32.mrb[20].mxu0 }
 0x12d   : > { %v1721_v59 = vpop.f32.mrb[20].mxu1  ;;  %v1260_v60 = vadd.f32 %v2101_v53, %v1203_v57  ;;  %v1210_v61 = vmax.f32 %v927_v20, %v1685_v58  ;;  %v991_v62 = vpop.f32.mrb[21].mxu0  ;;  %v1277_v3 = vmax.f32 %v1259_v56, 0.0 }
 0x12e   : > { %v1135_v63 = vpop.f32.mrb[21].mxu1  ;;  %v1204_v0 = vmax.f32 %v2040_v10, %v991_v62  ;;  %v1686_v1 = vpop.f32.mrb[22].mxu0 }
 0x12f   : > { %v1722_v2 = vpop.f32.mrb[22].mxu1  ;;  %v1278_v4 = vmax.f32 %v1260_v60, 0.0  ;;  %v1211_v5 = vmax.f32 %v1210_v61, %v1071_v21  ;;  %v1213_v6 = vmax.f32 %v930_v24, %v1686_v1  ;;  %v994_v7 = vpop.f32.mrb[23].mxu0 }
 0x130   : > { %v1138_v8 = vpop.f32.mrb[23].mxu1  ;;  %v1205_v9 = vmax.f32 %v1204_v0, %v2042_v11  ;;  %v1207_v12 = vmax.f32 %v2044_v14, %v994_v7 }
 0x131   : > { %v1571_v13 = vpack.c.bf16 %v1278_v4, %v1277_v3  ;;  %v1212_v10 = vmax.f32 %v1211_v5, %v1721_v59  ;;  %v1214_v16 = vmax.f32 %v1213_v6, %v1074_v25 }
 0x132   : > { %v1206_v17 = vmax.f32 %v1205_v9, %v1135_v63  ;;  %v1208_v20 = vmax.f32 %v1207_v12, %v2046_v15 }
 0x133   : > { %1572 = vst [vmem:[%s2109_s14] sm:$0xff] %v1571_v13   ;;  %v1263_v21 = vadd.f32 %v2101_v53, %v1212_v10  ;;  %v1215_v24 = vmax.f32 %v1214_v16, %v1722_v2 }
 0x134   : > { %v1261_v42 = vadd.f32 %v2101_v53, %v1206_v17  ;;  %v1209_v43 = vmax.f32 %v1208_v20, %v1138_v8  ;;  %v1689_v44 = vpop.f32.mrb[24].mxu0 }
 0x135   : > { %v1725_v47 = vpop.f32.mrb[24].mxu1  ;;  %v1264_v48 = vadd.f32 %v2101_v53, %v1215_v24  ;;  %v1222_v11 = vmax.f32 %v2060_v28, %v1689_v44  ;;  %v1007_v14 = vpop.f32.mrb[25].mxu0  ;;  %v1281_v55 = vmax.f32 %v1263_v21, 0.0 }
 0x136   : > { %v1151_v49 = vpop.f32.mrb[25].mxu1  ;;  %v1262_v25 = vadd.f32 %v2101_v53, %v1209_v43  ;;  %v1216_v50 = vmax.f32 %v2048_v18, %v1007_v14  ;;  %v1690_v15 = vpop.f32.mrb[26].mxu0  ;;  %v1279_v61 = vmax.f32 %v1261_v42, 0.0 }
 0x137   : > { %v1726_v54 = vpop.f32.mrb[26].mxu1  ;;  %v1282_v56 = vmax.f32 %v1264_v48, 0.0  ;;  %v1223_v57 = vmax.f32 %v1222_v11, %v2062_v29  ;;  %v1225_v58 = vmax.f32 %v2068_v32, %v1690_v15  ;;  %v1010_v59 = vpop.f32.mrb[27].mxu0 }
 0x138   : > { %v1154_v60 = vpop.f32.mrb[27].mxu1  ;;  %v1280_v28 = vmax.f32 %v1262_v25, 0.0  ;;  %v1217_v62 = vmax.f32 %v1216_v50, %v2050_v19  ;;  %v1219_v63 = vmax.f32 %v2052_v22, %v1010_v59 }
 0x139   : > { %v1581_v0 = vpack.c.bf16 %v1282_v56, %v1281_v55  ;;  %v1224_v18 = vmax.f32 %v1223_v57, %v1725_v47  ;;  %v1226_v1 = vmax.f32 %v1225_v58, %v2070_v33 }
 0x13a   : > { %v1576_v2 = vpack.c.bf16 %v1280_v28, %v1279_v61  ;;  %v1218_v3 = vmax.f32 %v1217_v62, %v1151_v49  ;;  %v1220_v4 = vmax.f32 %v1219_v63, %v2054_v23 }
 0x13b   : > { %1614 = vst [vmem:[%s2109_s14 + $0x10] sm:$0xff] %v1581_v0   ;;  %v1267_v29 = vadd.f32 %v2101_v53, %v1224_v18  ;;  %v1227_v32 = vmax.f32 %v1226_v1, %v1726_v54 }
 0x13c   : > { %1613 = vst [vmem:[%s2109_s14 + $0x8] sm:$0xff] %v1576_v2   ;;  %v1265_v5 = vadd.f32 %v2101_v53, %v1218_v3  ;;  %v1221_v6 = vmax.f32 %v1220_v4, %v1154_v60  ;;  %v1693_v7 = vpop.f32.mrb[28].mxu0 }
 0x13d   : > { %v1729_v19 = vpop.f32.mrb[28].mxu1  ;;  %v1268_v22 = vadd.f32 %v2101_v53, %v1227_v32  ;;  %v1234_v8 = vmax.f32 %v2076_v36, %v1693_v7  ;;  %v1023_v9 = vpop.f32.mrb[29].mxu0  ;;  %v1285_v16 = vmax.f32 %v1267_v29, 0.0 }
 0x13e   : > { %v1167_v33 = vpop.f32.mrb[29].mxu1  ;;  %v1266_v12 = vadd.f32 %v2101_v53, %v1221_v6  ;;  %v1228_v23 = vmax.f32 %v2056_v26, %v1023_v9  ;;  %v1694_v13 = vpop.f32.mrb[30].mxu0  ;;  %v1283_v43 = vmax.f32 %v1265_v5, 0.0 }
 0x13f   : > { %v1730_v10 = vpop.f32.mrb[30].mxu1  ;;  %v1286_v17 = vmax.f32 %v1268_v22, 0.0  ;;  %v1235_v20 = vmax.f32 %v1234_v8, %v2078_v37  ;;  %v1237_v21 = vmax.f32 %v2084_v40, %v1694_v13  ;;  %v1026_v24 = vpop.f32.mrb[31].mxu0 }
 0x140   : > { %v1170_v42 = vpop.f32.mrb[31].mxu1  ;;  %v1284_v36 = vmax.f32 %v1266_v12, 0.0  ;;  %v1229_v44 = vmax.f32 %v1228_v23, %v2058_v27  ;;  %v1231_v47 = vmax.f32 %v2064_v30, %v1026_v24 }
 0x141   : > { %v1591_v48 = vpack.c.bf16 %v1286_v17, %v1285_v16  ;;  %v1236_v26 = vmax.f32 %v1235_v20, %v1729_v19  ;;  %v1238_v11 = vmax.f32 %v1237_v21, %v2086_v41 }
 0x142   : > { %v1586_v14 = vpack.c.bf16 %v1284_v36, %v1283_v43  ;;  %v1230_v49 = vmax.f32 %v1229_v44, %v1167_v33  ;;  %v1232_v25 = vmax.f32 %v1231_v47, %v2066_v31 }
 0x143   : > { %1616 = vst [vmem:[%s2109_s14 + $0x20] sm:$0xff] %v1591_v48   ;;  %v1271_v37 = vadd.f32 %v2101_v53, %v1236_v26  ;;  %v1239_v40 = vmax.f32 %v1238_v11, %v1730_v10 }
 0x144   : > { %1615 = vst [vmem:[%s2109_s14 + $0x18] sm:$0xff] %v1586_v14   ;;  %v1269_v50 = vadd.f32 %v2101_v53, %v1230_v49  ;;  %v1233_v15 = vmax.f32 %v1232_v25, %v1170_v42  ;;  %v1697_v54 = vpop.f32.mrb[32].mxu0 }
 0x145   : > { %v1733_v27 = vpop.f32.mrb[32].mxu1  ;;  %v1272_v30 = vadd.f32 %v2101_v53, %v1239_v40  ;;  %v1246_v55 = vmax.f32 %v2090_v45, %v1697_v54  ;;  %v1039_v56 = vpop.f32.mrb[33].mxu0  ;;  %v1289_v60 = vmax.f32 %v1271_v37, 0.0 }
 0x146   : > { %v1183_v41 = vpop.f32.mrb[33].mxu1  ;;  %v1270_v57 = vadd.f32 %v2101_v53, %v1233_v15  ;;  %v1240_v31 = vmax.f32 %v2072_v34, %v1039_v56  ;;  %v1698_v58 = vpop.f32.mrb[34].mxu0  ;;  %v1287_v18 = vmax.f32 %v1269_v50, 0.0 }
 0x147   : > { %v1734_v59 = vpop.f32.mrb[34].mxu1  ;;  %v1290_v61 = vmax.f32 %v1272_v30, 0.0  ;;  %v1247_v28 = vmax.f32 %v1246_v55, %v2092_v46  ;;  %v1249_v62 = vmax.f32 %v2094_v51, %v1698_v58  ;;  %v1042_v63 = vpop.f32.mrb[35].mxu0 }
 0x148   : > { %v1186_v0 = vpop.f32.mrb[35].mxu1  ;;  %v1288_v45 = vmax.f32 %v1270_v57, 0.0  ;;  %v1241_v1 = vmax.f32 %v1240_v31, %v2074_v35  ;;  %v1243_v2 = vmax.f32 %v2080_v38, %v1042_v63 }
 0x149   : > { %v1601_v3 = vpack.c.bf16 %v1290_v61, %v1289_v60  ;;  %v1248_v34 = vmax.f32 %v1247_v28, %v1733_v27  ;;  %v1250_v4 = vmax.f32 %v1249_v62, %v2096_v52 }
 0x14a   : > { %v1596_v29 = vpack.c.bf16 %v1288_v45, %v1287_v18  ;;  %v1242_v32 = vmax.f32 %v1241_v1, %v1183_v41  ;;  %v1244_v46 = vmax.f32 %v1243_v2, %v2082_v39 }
 0x14b   : > { %1618 = vst [vmem:[%s2109_s14 + $0x30] sm:$0xff] %v1601_v3   ;;  %v1275_v51 = vadd.f32 %v2101_v53, %v1248_v34  ;;  %v1251_v5 = vmax.f32 %v1250_v4, %v1734_v59 }
 0x14c   : > { %1617 = vst [vmem:[%s2109_s14 + $0x28] sm:$0xff] %v1596_v29   ;;  %v1273_v6 = vadd.f32 %v2101_v53, %v1242_v32  ;;  %v1245_v35 = vmax.f32 %v1244_v46, %v1186_v0 }
 0x14d   : > { %v1276_v38 = vadd.f32 %v2101_v53, %v1251_v5  ;;  %v1293_v19 = vmax.f32 %v1275_v51, 0.0 }
 0x14e   : > { %v1274_v7 = vadd.f32 %v2101_v53, %v1245_v35  ;;  %v1291_v22 = vmax.f32 %v1273_v6, 0.0 }
 0x14f   : > { %v1294_v52 = vmax.f32 %v1276_v38, 0.0 }
 0x150   : > { %v1292_v8 = vmax.f32 %v1274_v7, 0.0 }
 0x151   : > { %v1611_v9 = vpack.c.bf16 %v1294_v52, %v1293_v19 }
 0x152   : > { %v1606_v33 = vpack.c.bf16 %v1292_v8, %v1291_v22 }
 0x153   : > { %1620 = vst [vmem:[%s2109_s14 + $0x40] sm:$0xff] %v1611_v9  }
 0x154   : > { %1619 = vst [vmem:[%s2109_s14 + $0x38] sm:$0xff] %v1606_v33  }
 0x155 PF: > { %p10_p9 = scmp.ge.s32.totalorder %s1864_s16, 4   ;;  %s2177_s12 = smov %s1821_s13 }
 0x156   : > { %s2178_s13 = smov %s1873_s19  ;;  %s2179_s14 = smov %s1864_s16 }
 0x157   :  { %12 = sbr.rel (!%p10_p9) target bundleno = 2 (0x2), region = 108 }

// kernel: lenet_forward.4
= control target key start
LH: loop header
LB: loop body
LE: loop exit
PB: predicated region body
PF: predicated region fallthrough
CT: control target
= control target key end

     0   :  { %s689_s12 = smov 0   ;;  %s691_s13 = smov 0   ;;  %s788_s0 = inlined_call_operand.vmem [shape: bf16[4,32,160], index: 0, kind: input, shape index: {}]   ;;  %s789_s1 = inlined_call_operand.vmem [shape: bf16[160,128], index: 1, kind: input, shape index: {}]   ;;  %s790_s2 = inlined_call_operand.vmem [shape: f32[1,128], index: 2, kind: input, shape index: {}]   ;;  %s791_s3 = inlined_call_operand.vmem [shape: bf16[32,128], index: 3, kind: output, shape index: {}]  }
   0x1   :  { %s693_s14 = smov 0  }
   0x2 LB: > { %s529_s15 = sadd.s32 4294967295, %s666_s14   ;;  %s706_s16 = sadd.s32 1, %s666_s14   ;;  %s666_s14 = sphi %s693_s14, %s794_s14   ;;  %s662_s13 = sphi %s691_s13, %s793_s13   ;;  %s658_s12 = sphi %s689_s12, %s792_s12  }
   0x3   : > { %s17_s17 = ssub.s32 %s666_s14, %s706_s16  ;;  %s20_s18 = sadd.s32 1, %s662_s13 }
   0x4   : > { %p18_p0 = scmp.eq.s32.totalorder %s17_s17, 0  ;;  %p27_p1 = scmp.ne.s32.totalorder %s662_s13, %s658_s12 }
   0x5   : > { %p28_p2 = scmp.eq.s32.totalorder %s666_s14, 0  ;;  %p532_p4 = scmp.ge.s32.totalorder %s666_s14, 2 }
   0x6   : > { %s715_s19 = scalar_select %p18_p0, %s662_s13, %s20_s18  }
   0x7   : > { %p29_p3 = por %p28_p2, %p27_p1  ;;  %127 = sbr.rel (%p532_p4) target bundleno = 22 (0x16), region = 24 }
   0xe   : > { %130 = sbr.rel (!%p29_p3) target bundleno = 22 (0x16), region = 28  ;;  %s132_s20 = sand.u32 (%p29_p3), 1, %s662_s13  }
   0xf   : > { %s569_s21 = sshll.u32 (%p29_p3), %s666_s14, 4  ;;  %s533_s22 = sshll.u32 (%p29_p3), %s132_s20, 6 }
  0x10   : > { %s138_s25 = scalar_lea.vmem (%p29_p3), %s788_s0, %s569_s21  ;;  %s134_s26 = scalar_lea.vmem (%p29_p3), [#allocation2], %s533_s22 }
  0x11   : > { %v180_v0 = vld [vmem:[%s138_s25] sm:$0xff] (%p29_p3)  ;;  %v182_v1 = vld [vmem:[%s138_s25 + $0x8] sm:$0xff] (%p29_p3) }
  0x12   : > { %v184_v2 = vld [vmem:[%s138_s25 + $0x20] sm:$0xff] (%p29_p3)  ;;  %181 = vst [vmem:[%s134_s26] sm:$0xff] (%p29_p3), %v180_v0  ;;  %183 = vst [vmem:[%s134_s26 + $0x8] sm:$0xff] (%p29_p3), %v182_v1  ;;  %v186_v3 = vld [vmem:[%s138_s25 + $0x28] sm:$0xff] (%p29_p3) }
  0x13   : > { %185 = vst [vmem:[%s134_s26 + $0x10] sm:$0xff] (%p29_p3), %v184_v2  ;;  %v188_v4 = vld [vmem:[%s138_s25 + $0x40] sm:$0xff] (%p29_p3)  ;;  %v190_v5 = vld [vmem:[%s138_s25 + $0x48] sm:$0xff] (%p29_p3)  ;;  %187 = vst [vmem:[%s134_s26 + $0x18] sm:$0xff] (%p29_p3), %v186_v3 }
  0x14   : > { %189 = vst [vmem:[%s134_s26 + $0x20] sm:$0xff] (%p29_p3), %v188_v4  ;;  %191 = vst [vmem:[%s134_s26 + $0x28] sm:$0xff] (%p29_p3), %v190_v5  ;;  %v192_v6 = vld [vmem:[%s138_s25 + $0x60] sm:$0xff] (%p29_p3)  ;;  %v194_v7 = vld [vmem:[%s138_s25 + $0x68] sm:$0xff] (%p29_p3) }
  0x15   : > { %193 = vst [vmem:[%s134_s26 + $0x30] sm:$0xff] %v192_v6  ;;  %195 = vst [vmem:[%s134_s26 + $0x38] sm:$0xff] %v194_v7 }
  0x16 PF: > { %p537_p5 = scmp.ge.s32.totalorder %s666_s14, 1  ;;  %p200_p6 = scmp.lt.s32.totalorder %s666_s14, 3 }
  0x18   : > { %p201_p7 = pnand %p537_p5, %p200_p6 }
  0x19   : > { %v622_v8 = vld [vmem:[%s789_s1] sm:$0xff] (!%p201_p7)   ;;  %v668_v9 = vmov (!%p201_p7), 0   ;;  %v623_v10 = vld [vmem:[%s789_s1 + $0x8] sm:$0xff] (!%p201_p7)   ;;  %s207_s4 = sand.u32 (!%p201_p7), 1, %s658_s12   ;;  %v624_v11 = vld [vmem:[%s789_s1 + $0x10] sm:$0xff] (!%p201_p7)   ;;  %vm362_vm0 = vcmask (!%p201_p7), 261120  }
  0x1a   : > { %204 = sbr.rel (%p201_p7) target bundleno = 299 (0x12b), region = 66  ;;  %375 = vmatprep.subr.bf16.mxu0 (!%p201_p7), %v668_v9  ;;  %577 = vmatprep.subr.bf16.mxu1 (!%p201_p7), %v668_v9  ;;  %s538_s5 = sshll.u32 (!%p201_p7), %s207_s4, 6  ;;  %v625_v12 = vld [vmem:[%s789_s1 + $0x18] sm:$0xff] (!%p201_p7)   ;;  %v626_v15 = vld [vmem:[%s789_s1 + $0x20] sm:$0xff] (!%p201_p7)   ;;  %v627_v16 = vld [vmem:[%s789_s1 + $0x28] sm:$0xff] (!%p201_p7)  }
  0x1b   : > { %376 = vmatpush1.bf16.msra.mxu0 (!%p201_p7), %v622_v8  ;;  %587 = vmatpush1.bf16.msra.mxu1 (!%p201_p7), %v622_v8  ;;  %s738_s10 = scalar_lea.vmem (!%p201_p7), [#allocation2], %s538_s5  ;;  %v628_v17 = vld [vmem:[%s789_s1 + $0x30] sm:$0xff] (!%p201_p7)   ;;  %v629_v18 = vld [vmem:[%s789_s1 + $0x38] sm:$0xff] (!%p201_p7)   ;;  %v630_v19 = vld [vmem:[%s789_s1 + $0x40] sm:$0xff] (!%p201_p7)   ;;  %s539_s28 = sshll.u32 (!%p201_p7), %s529_s15, 1 }
  0x1c   : > { %377 = vmatprep.subr.bf16.mxu0 (!%p201_p7), %v668_v9  ;;  %578 = vmatprep.subr.bf16.mxu1 (!%p201_p7), %v668_v9  ;;  %v634_v13 = vld [vmem:[%s738_s10 + $0x4] ss:$8 sps:$4 sm:$0xff] (!%p201_p7)   ;;  %v632_v21 = vld [vmem:[%s738_s10] ss:$8 sps:$4 sm:$0xff] (!%p201_p7)   ;;  %v638_v23 = vld [vmem:[%s738_s10 + $0x14] ss:$8 sps:$4 sm:$0xff] (!%p201_p7)  }
  0x1d   : > { %v637_v14 = vld [vmem:[%s738_s10 + $0x24] ss:$8 sps:$4 sm:$0xff] (!%p201_p7)   ;;  %559 = vmatprep.mubr.msk.bf16.mxu0 (!%p201_p7), %vm362_vm0, %v634_v13  ;;  %v635_v22 = vld [vmem:[%s738_s10 + $0x20] ss:$8 sps:$4 sm:$0xff] (!%p201_p7)   ;;  %v640_v24 = vld [vmem:[%s738_s10 + $0x34] ss:$8 sps:$4 sm:$0xff] (!%p201_p7)  }
  0x1e   : > { %561 = vmatprep.mubr.msk.bf16.mxu1 (!%p201_p7), %vm362_vm0, %v637_v14  ;;  %v631_v20 = vld [vmem:[%s789_s1 + $0x48] sm:$0xff] (!%p201_p7)   ;;  %v642_v25 = vld [vmem:[%s738_s10 + $0x10] ss:$8 sps:$4 sm:$0xff] (!%p201_p7)   ;;  %p232_p8 = scmp.lt.s32.totalorder (!%p201_p7), %s539_s28, 3  ;;  %v563_v42 = vld [vmem:[%s790_s2] ss:$0 sm:$0xff] (!%p201_p7) }
  0x1f   : > { %378 = vmatpush1.bf16.msra.mxu0 (!%p201_p7), %v623_v10  ;;  %588 = vmatpush1.bf16.msra.mxu1 (!%p201_p7), %v623_v10  ;;  %v643_v26 = vld [vmem:[%s738_s10 + $0x30] ss:$8 sps:$4 sm:$0xff] (!%p201_p7)  }
  0x20   : > { %379 = vmatprep.subr.bf16.mxu0 (!%p201_p7), %v668_v9  ;;  %579 = vmatprep.subr.bf16.mxu1 (!%p201_p7), %v668_v9 }
  0x21   : > { %s796_s28 = smov (!%p232_p8, %s539_s28), 3 }
  0x22   : > { %s540_s14 = sshll.u32 %s796_s28, 2 }
  0x23   : > { %380 = vmatpush1.bf16.msra.mxu0 %v624_v11  ;;  %589 = vmatpush1.bf16.msra.mxu1 %v624_v11  ;;  %s235_s5 = scalar_lea.vmem %s791_s3, %s540_s14 }
  0x24   : > { %381 = vmatprep.subr.bf16.mxu0 %v668_v9  ;;  %580 = vmatprep.subr.bf16.mxu1 %v668_v9 }
  0x27   : > { %382 = vmatpush1.bf16.msra.mxu0 %v625_v12  ;;  %590 = vmatpush1.bf16.msra.mxu1 %v625_v12 }
  0x28   : > { %383 = vmatprep.subr.bf16.mxu0 %v668_v9  ;;  %581 = vmatprep.subr.bf16.mxu1 %v668_v9 }
  0x2b   : > { %384 = vmatpush1.bf16.msra.mxu0 %v626_v15  ;;  %591 = vmatpush1.bf16.msra.mxu1 %v626_v15 }
  0x2c   : > { %385 = vmatprep.subr.bf16.mxu0 %v668_v9  ;;  %582 = vmatprep.subr.bf16.mxu1 %v668_v9 }
  0x2f   : > { %386 = vmatpush1.bf16.msra.mxu0 %v627_v16  ;;  %592 = vmatpush1.bf16.msra.mxu1 %v627_v16 }
  0x30   : > { %387 = vmatprep.subr.bf16.mxu0 %v668_v9  ;;  %583 = vmatprep.subr.bf16.mxu1 %v668_v9 }
  0x33   : > { %388 = vmatpush1.bf16.msra.mxu0 %v628_v17  ;;  %593 = vmatpush1.bf16.msra.mxu1 %v628_v17 }
  0x34   : > { %389 = vmatprep.subr.bf16.mxu0 %v668_v9  ;;  %584 = vmatprep.subr.bf16.mxu1 %v668_v9 }
  0x37   : > { %390 = vmatpush1.bf16.msra.mxu0 %v629_v18  ;;  %594 = vmatpush1.bf16.msra.mxu1 %v629_v18 }
  0x38   : > { %391 = vmatprep.subr.bf16.mxu0 %v668_v9  ;;  %585 = vmatprep.subr.bf16.mxu1 %v668_v9 }
  0x3b   : > { %392 = vmatpush1.bf16.msra.mxu0 %v630_v19  ;;  %595 = vmatpush1.bf16.msra.mxu1 %v630_v19 }
  0x3c   : > { %393 = vmatprep.subr.bf16.mxu0 %v668_v9  ;;  %586 = vmatprep.subr.bf16.mxu1 %v668_v9 }
  0x3f   : > { %394 = vmatpush1.bf16.msra.mxu0 %v631_v20  ;;  %596 = vmatpush1.bf16.msra.mxu1 %v631_v20 }
  0x42   : > { %408 = vmatmul.mubr.bf16.vlgmr.msra.gmra.mrb[0].mxu0 %v632_v21  ;;  %424 = vmatmul.mubr.bf16.vlgmr.msra.gmra.mrb[0].mxu1 %v635_v22 }
  0x43   : > { %560 = vmatprep.mubr.msk.bf16.mxu0 %vm362_vm0, %v638_v23  ;;  %562 = vmatprep.mubr.msk.bf16.mxu1 %vm362_vm0, %v640_v24 }
  0x4a   : > { %416 = vmatmul.mubr.bf16.gmra.mrb[4].mxu0 %v642_v25  ;;  %432 = vmatmul.mubr.bf16.gmra.mrb[4].mxu1 %v643_v26 }
 0x115   : > { %v409_v27 = vpop.f32.mrb[0].mxu0  ;;  %v425_v28 = vpop.f32.mrb[0].mxu1 }
 0x116   : > { %v440_v29 = vmax.f32 %v409_v27, %v425_v28  ;;  %v411_v30 = vpop.f32.mrb[1].mxu0  ;;  %v427_v31 = vpop.f32.mrb[1].mxu1 }
 0x117   : > { %v412_v32 = vpop.f32.mrb[2].mxu0  ;;  %v428_v33 = vpop.f32.mrb[2].mxu1 }
 0x118   : > { %v443_v34 = vmax.f32 %v412_v32, %v428_v33  ;;  %v414_v35 = vpop.f32.mrb[3].mxu0  ;;  %v430_v36 = vpop.f32.mrb[3].mxu1 }
 0x11d   : > { %v417_v37 = vpop.f32.mrb[4].mxu0  ;;  %v433_v38 = vpop.f32.mrb[4].mxu1 }
 0x11e   : > { %v441_v39 = vmax.f32 %v417_v37, %v433_v38  ;;  %v419_v40 = vpop.f32.mrb[5].mxu0  ;;  %v435_v41 = vpop.f32.mrb[5].mxu1 }
 0x11f   : > { %v420_v43 = vpop.f32.mrb[6].mxu0  ;;  %v436_v44 = vpop.f32.mrb[6].mxu1 }
 0x120   : > { %v442_v45 = vmax.f32 %v440_v29, %v441_v39  ;;  %v444_v46 = vmax.f32 %v420_v43, %v436_v44  ;;  %v422_v47 = vpop.f32.mrb[7].mxu0  ;;  %v438_v48 = vpop.f32.mrb[7].mxu1 }
 0x122   : > { %v453_v49 = vadd.f32 %v563_v42, %v442_v45  ;;  %v445_v50 = vmax.f32 %v443_v34, %v444_v46 }
 0x124   : > { %v454_v51 = vadd.f32 %v563_v42, %v445_v50  ;;  %v455_v52 = vmax.f32 %v453_v49, 0.0 }
 0x126   : > { %v456_v53 = vmax.f32 %v454_v51, 0.0 }
 0x128   : > { %v575_v54 = vpack.c.bf16 %v456_v53, %v455_v52 }
 0x12a   : > { %576 = vst [vmem:[%s235_s5] sm:$0xff] %v575_v54  }
 0x12b PF: > { %p10_p9 = scmp.ge.s32.totalorder %s706_s16, 4   ;;  %s792_s12 = smov %s662_s13 }
 0x12c   : > { %s793_s13 = smov %s715_s19  ;;  %s794_s14 = smov %s706_s16 }
 0x12d   :  { %12 = sbr.rel (!%p10_p9) target bundleno = 2 (0x2), region = 105 }

// kernel: lenet_forward.5
= control target key start
LH: loop header
LB: loop body
LE: loop exit
PB: predicated region body
PF: predicated region fallthrough
CT: control target
= control target key end

     0   :  { %vm2262_vm0 = vmmov 0   ;;  %s2816_s1 = inlined_call_operand.vmem [shape: bf16[2048,128], index: 1, kind: input, shape index: {}]   ;;  %s2817_s0 = inlined_call_operand.vmem [shape: bf16[16,2048], index: 0, kind: input, shape index: {}]   ;;  %s2818_s3 = inlined_call_operand.vmem [shape: bf16[128,128], index: 3, kind: input, shape index: {}]   ;;  %s2819_s5 = inlined_call_operand.vmem [shape: bf16[128,128], index: 5, kind: input, shape index: {}]   ;;  %s2820_s2 = inlined_call_operand.vmem [shape: f32[1,128], index: 2, kind: input, shape index: {}]   ;;  %s2821_s4 = inlined_call_operand.vmem [shape: f32[1,128], index: 4, kind: input, shape index: {}]   ;;  %s2822_s6 = inlined_call_operand.vmem [shape: f32[1,128], index: 6, kind: input, shape index: {}]   ;;  %s2823_s7 = inlined_call_operand.vmem [shape: f32[16,128], index: 7, kind: output, shape index: {}]  }
   0x1   :  { %v2117_v0 = vld [vmem:[%s2816_s1 + $0x40] sm:$0xff]   ;;  %v2121_v4 = vld [vmem:[%s2816_s1 + $0x48] sm:$0xff]   ;;  %v2125_v8 = vld [vmem:[%s2816_s1 + $0x50] sm:$0xff]  }
   0x2   :  { %v2118_v1 = vld [vmem:[%s2816_s1 + $0xc0] sm:$0xff]   ;;  %1881 = vmatprep.subr.bf16.mxu0 %v2117_v0  ;;  %v2122_v5 = vld [vmem:[%s2816_s1 + $0xc8] sm:$0xff]   ;;  %v2126_v9 = vld [vmem:[%s2816_s1 + $0xd0] sm:$0xff]  }
   0x3   :  { %v2119_v2 = vld [vmem:[%s2816_s1] sm:$0xff]   ;;  %1903 = vmatprep.subr.bf16.mxu1 %v2118_v1  ;;  %v2123_v6 = vld [vmem:[%s2816_s1 + $0x8] sm:$0xff]   ;;  %v2127_v10 = vld [vmem:[%s2816_s1 + $0x10] sm:$0xff]  }
   0x4   :  { %v2120_v3 = vld [vmem:[%s2816_s1 + $0x80] sm:$0xff]   ;;  %1882 = vmatpush3.bf16.msra.mxu0 %v2119_v2  ;;  %v2124_v7 = vld [vmem:[%s2816_s1 + $0x88] sm:$0xff]   ;;  %v2128_v11 = vld [vmem:[%s2816_s1 + $0x90] sm:$0xff]  }
   0x5   :  { %1904 = vmatpush3.bf16.msra.mxu1 %v2120_v3  ;;  %1883 = vmatprep.subr.bf16.mxu0 %v2121_v4  ;;  %v2129_v12 = vld [vmem:[%s2816_s1 + $0x58] sm:$0xff]   ;;  %v2133_v16 = vld [vmem:[%s2816_s1 + $0x60] sm:$0xff]   ;;  %v2137_v20 = vld [vmem:[%s2816_s1 + $0x68] sm:$0xff]  }
   0x6   :  { %1905 = vmatprep.subr.bf16.mxu1 %v2122_v5  ;;  %v2130_v13 = vld [vmem:[%s2816_s1 + $0xd8] sm:$0xff]   ;;  %v2134_v17 = vld [vmem:[%s2816_s1 + $0xe0] sm:$0xff]   ;;  %v2138_v21 = vld [vmem:[%s2816_s1 + $0xe8] sm:$0xff]  }
   0x7   :  { %v2131_v14 = vld [vmem:[%s2816_s1 + $0x18] sm:$0xff]   ;;  %v2135_v18 = vld [vmem:[%s2816_s1 + $0x20] sm:$0xff]   ;;  %v2139_v22 = vld [vmem:[%s2816_s1 + $0x28] sm:$0xff]  }
   0x8   :  { %1884 = vmatpush3.bf16.msra.mxu0 %v2123_v6  ;;  %v2132_v15 = vld [vmem:[%s2816_s1 + $0x98] sm:$0xff]   ;;  %v2136_v19 = vld [vmem:[%s2816_s1 + $0xa0] sm:$0xff]   ;;  %v2140_v23 = vld [vmem:[%s2816_s1 + $0xa8] sm:$0xff]  }
   0x9   :  { %1906 = vmatpush3.bf16.msra.mxu1 %v2124_v7  ;;  %1885 = vmatprep.subr.bf16.mxu0 %v2125_v8  ;;  %v2141_v24 = vld [vmem:[%s2816_s1 + $0x70] sm:$0xff]   ;;  %v2145_v28 = vld [vmem:[%s2816_s1 + $0x78] sm:$0xff]   ;;  %v27_v32 = vld [vmem:[%s2817_s0] sm:$0xff] }
   0xa   :  { %1907 = vmatprep.subr.bf16.mxu1 %v2126_v9  ;;  %v2142_v25 = vld [vmem:[%s2816_s1 + $0xf0] sm:$0xff]   ;;  %v2146_v29 = vld [vmem:[%s2816_s1 + $0xf8] sm:$0xff]   ;;  %v35_v33 = vld [vmem:[%s2817_s0 + $0x40] sm:$0xff] }
   0xb   :  { %v2143_v26 = vld [vmem:[%s2816_s1 + $0x30] sm:$0xff]   ;;  %v2147_v30 = vld [vmem:[%s2816_s1 + $0x38] sm:$0xff]   ;;  %v28_v34 = vld [vmem:[%s2817_s0 + $0x8] sm:$0xff]  ;;  %v1719_v35 = vcombine.low %v27_v32, %v35_v33  ;;  %v1720_v36 = vcombine.high %v27_v32, %v35_v33 }
   0xc   :  { %1886 = vmatpush3.bf16.msra.mxu0 %v2127_v10  ;;  %v2144_v27 = vld [vmem:[%s2816_s1 + $0xb0] sm:$0xff]   ;;  %v2148_v31 = vld [vmem:[%s2816_s1 + $0xb8] sm:$0xff]   ;;  %v36_v37 = vld [vmem:[%s2817_s0 + $0x48] sm:$0xff] }
   0xd   :  { %1908 = vmatpush3.bf16.msra.mxu1 %v2128_v11  ;;  %1887 = vmatprep.subr.bf16.mxu0 %v2129_v12  ;;  %v1721_v38 = vcombine.low %v28_v34, %v36_v37  ;;  %v1722_v39 = vcombine.high %v28_v34, %v36_v37  ;;  %v2149_v40 = vld [vmem:[%s2816_s1 + $0x140] sm:$0xff]   ;;  %v2153_v44 = vld [vmem:[%s2816_s1 + $0x148] sm:$0xff]   ;;  %v2157_v48 = vld [vmem:[%s2816_s1 + $0x150] sm:$0xff]  }
   0xe   :  { %1909 = vmatprep.subr.bf16.mxu1 %v2130_v13  ;;  %1186 = vmatprep.mubr.bf16.mxu0 %v1720_v36  ;;  %v2150_v41 = vld [vmem:[%s2816_s1 + $0x1c0] sm:$0xff]   ;;  %v2154_v45 = vld [vmem:[%s2816_s1 + $0x1c8] sm:$0xff]   ;;  %v2158_v49 = vld [vmem:[%s2816_s1 + $0x1d0] sm:$0xff]  }
   0xf   :  { %1227 = vmatprep.mubr.bf16.mxu1 %v1722_v39  ;;  %v2151_v42 = vld [vmem:[%s2816_s1 + $0x100] sm:$0xff]   ;;  %v2155_v46 = vld [vmem:[%s2816_s1 + $0x108] sm:$0xff]   ;;  %v2159_v50 = vld [vmem:[%s2816_s1 + $0x110] sm:$0xff]  }
  0x10   :  { %1888 = vmatpush3.bf16.msra.mxu0 %v2131_v14  ;;  %v2152_v43 = vld [vmem:[%s2816_s1 + $0x180] sm:$0xff]   ;;  %v2156_v47 = vld [vmem:[%s2816_s1 + $0x188] sm:$0xff]   ;;  %v2160_v51 = vld [vmem:[%s2816_s1 + $0x190] sm:$0xff]  }
  0x11   :  { %1910 = vmatpush3.bf16.msra.mxu1 %v2132_v15  ;;  %1889 = vmatprep.subr.bf16.mxu0 %v2133_v16  ;;  %v2161_v52 = vld [vmem:[%s2816_s1 + $0x158] sm:$0xff]   ;;  %v2165_v56 = vld [vmem:[%s2816_s1 + $0x160] sm:$0xff]   ;;  %v2169_v60 = vld [vmem:[%s2816_s1 + $0x168] sm:$0xff]  }
  0x12   :  { %1911 = vmatprep.subr.bf16.mxu1 %v2134_v17  ;;  %v2162_v53 = vld [vmem:[%s2816_s1 + $0x1d8] sm:$0xff]   ;;  %v2166_v57 = vld [vmem:[%s2816_s1 + $0x1e0] sm:$0xff]   ;;  %v2170_v61 = vld [vmem:[%s2816_s1 + $0x1e8] sm:$0xff]  }
  0x13   :  { %v2163_v54 = vld [vmem:[%s2816_s1 + $0x118] sm:$0xff]   ;;  %v2167_v58 = vld [vmem:[%s2816_s1 + $0x120] sm:$0xff]   ;;  %v2171_v62 = vld [vmem:[%s2816_s1 + $0x128] sm:$0xff]  }
  0x14   :  { %1890 = vmatpush3.bf16.msra.mxu0 %v2135_v18  ;;  %v2164_v55 = vld [vmem:[%s2816_s1 + $0x198] sm:$0xff]   ;;  %v2168_v59 = vld [vmem:[%s2816_s1 + $0x1a0] sm:$0xff]   ;;  %v2172_v63 = vld [vmem:[%s2816_s1 + $0x1a8] sm:$0xff]  }
  0x15   :  { %1912 = vmatpush3.bf16.msra.mxu1 %v2136_v19  ;;  %1891 = vmatprep.subr.bf16.mxu0 %v2137_v20  ;;  %v2173_v0 = vld [vmem:[%s2816_s1 + $0x170] sm:$0xff]   ;;  %v2177_v4 = vld [vmem:[%s2816_s1 + $0x178] sm:$0xff]   ;;  %v2181_v16 = vld [vmem:[%s2816_s1 + $0x240] sm:$0xff]  }
  0x16   :  { %1913 = vmatprep.subr.bf16.mxu1 %v2138_v21  ;;  %v2174_v1 = vld [vmem:[%s2816_s1 + $0x1f0] sm:$0xff]   ;;  %v2178_v5 = vld [vmem:[%s2816_s1 + $0x1f8] sm:$0xff]   ;;  %v2182_v17 = vld [vmem:[%s2816_s1 + $0x2c0] sm:$0xff]  }
  0x17   :  { %v2175_v2 = vld [vmem:[%s2816_s1 + $0x130] sm:$0xff]   ;;  %v2179_v6 = vld [vmem:[%s2816_s1 + $0x138] sm:$0xff]   ;;  %v2183_v18 = vld [vmem:[%s2816_s1 + $0x200] sm:$0xff]  }
  0x18   :  { %1892 = vmatpush3.bf16.msra.mxu0 %v2139_v22  ;;  %v2176_v3 = vld [vmem:[%s2816_s1 + $0x1b0] sm:$0xff]   ;;  %v2180_v7 = vld [vmem:[%s2816_s1 + $0x1b8] sm:$0xff]   ;;  %v2184_v19 = vld [vmem:[%s2816_s1 + $0x280] sm:$0xff]  }
  0x19   :  { %1914 = vmatpush3.bf16.msra.mxu1 %v2140_v23  ;;  %1893 = vmatprep.subr.bf16.mxu0 %v2141_v24  ;;  %v29_v8 = vld [vmem:[%s2817_s0 + $0x10] sm:$0xff]  ;;  %v30_v12 = vld [vmem:[%s2817_s0 + $0x18] sm:$0xff]  ;;  %v2185_v20 = vld [vmem:[%s2816_s1 + $0x248] sm:$0xff]  }
  0x1a   :  { %1915 = vmatprep.subr.bf16.mxu1 %v2142_v25  ;;  %v37_v9 = vld [vmem:[%s2817_s0 + $0x50] sm:$0xff]  ;;  %v38_v13 = vld [vmem:[%s2817_s0 + $0x58] sm:$0xff]  ;;  %v2186_v21 = vld [vmem:[%s2816_s1 + $0x2c8] sm:$0xff]  }
  0x1b   :  { %v1723_v10 = vcombine.low %v29_v8, %v37_v9  ;;  %v1724_v11 = vcombine.high %v29_v8, %v37_v9  ;;  %v1725_v14 = vcombine.low %v30_v12, %v38_v13  ;;  %v1726_v15 = vcombine.high %v30_v12, %v38_v13  ;;  %v2187_v22 = vld [vmem:[%s2816_s1 + $0x208] sm:$0xff]   ;;  %v2189_v24 = vld [vmem:[%s2816_s1 + $0x250] sm:$0xff]   ;;  %v2197_v32 = vld [vmem:[%s2816_s1 + $0x260] sm:$0xff]  }
  0x1c   :  { %1894 = vmatpush3.bf16.msra.mxu0 %v2143_v26  ;;  %v2188_v23 = vld [vmem:[%s2816_s1 + $0x288] sm:$0xff]   ;;  %v2190_v25 = vld [vmem:[%s2816_s1 + $0x2d0] sm:$0xff]   ;;  %v2198_v33 = vld [vmem:[%s2816_s1 + $0x2e0] sm:$0xff]  }
  0x1d   :  { %1916 = vmatpush3.bf16.msra.mxu1 %v2144_v27  ;;  %1895 = vmatprep.subr.bf16.mxu0 %v2145_v28  ;;  %v2191_v26 = vld [vmem:[%s2816_s1 + $0x210] sm:$0xff]   ;;  %v2193_v28 = vld [vmem:[%s2816_s1 + $0x258] sm:$0xff]   ;;  %v2199_v34 = vld [vmem:[%s2816_s1 + $0x220] sm:$0xff]  }
  0x1e   :  { %1917 = vmatprep.subr.bf16.mxu1 %v2146_v29  ;;  %v2192_v27 = vld [vmem:[%s2816_s1 + $0x290] sm:$0xff]   ;;  %v2194_v29 = vld [vmem:[%s2816_s1 + $0x2d8] sm:$0xff]   ;;  %v2201_v36 = vld [vmem:[%s2816_s1 + $0x268] sm:$0xff]  }
  0x1f   :  { %v2202_v37 = vld [vmem:[%s2816_s1 + $0x2e8] sm:$0xff]   ;;  %v2229_v8 = vld [vmem:[%s2816_s1 + $0x360] sm:$0xff]  }
  0x20   :  { %1896 = vmatpush3.bf16.msra.mxu0 %v2147_v30  ;;  %v2195_v30 = vld [vmem:[%s2816_s1 + $0x218] sm:$0xff]   ;;  %v2204_v39 = vld [vmem:[%s2816_s1 + $0x2a8] sm:$0xff]   ;;  %v2230_v9 = vld [vmem:[%s2816_s1 + $0x3e0] sm:$0xff]  }
  0x21   :  { %1918 = vmatpush3.bf16.msra.mxu1 %v2148_v31  ;;  %1925 = vmatprep.subr.bf16.mxu0 %v2149_v40  ;;  %v2196_v31 = vld [vmem:[%s2816_s1 + $0x298] sm:$0xff]   ;;  %v2205_v40 = vld [vmem:[%s2816_s1 + $0x270] sm:$0xff]   ;;  %v2233_v12 = vld [vmem:[%s2816_s1 + $0x368] sm:$0xff]  }
  0x22   :  { %1947 = vmatprep.subr.bf16.mxu1 %v2150_v41  ;;  %v2206_v41 = vld [vmem:[%s2816_s1 + $0x2f0] sm:$0xff]   ;;  %v2234_v13 = vld [vmem:[%s2816_s1 + $0x3e8] sm:$0xff]  }
  0x23   :  { %1187 = vmatmul.mubr.bf16.vlgmr.msra.gmra.mrb[0].mxu0 %v1719_v35  ;;  %v2200_v35 = vld [vmem:[%s2816_s1 + $0x2a0] sm:$0xff]  }
  0x24   :  { %1228 = vmatmul.mubr.bf16.vlgmr.msra.gmra.mrb[0].mxu1 %v1721_v38  ;;  %1926 = vmatpush3.bf16.msra.mxu0 %v2151_v42  ;;  %v2203_v38 = vld [vmem:[%s2816_s1 + $0x228] sm:$0xff]   ;;  %v2207_v42 = vld [vmem:[%s2816_s1 + $0x230] sm:$0xff]  }
  0x25   :  { %1948 = vmatpush3.bf16.msra.mxu1 %v2152_v43  ;;  %1927 = vmatprep.subr.bf16.mxu0 %v2153_v44  ;;  %v2208_v43 = vld [vmem:[%s2816_s1 + $0x2b0] sm:$0xff]   ;;  %v2209_v44 = vld [vmem:[%s2816_s1 + $0x278] sm:$0xff]  }
  0x26   :  { %1949 = vmatprep.subr.bf16.mxu1 %v2154_v45  ;;  %1268 = vmatprep.mubr.bf16.mxu0 %v1724_v11  ;;  %v2210_v45 = vld [vmem:[%s2816_s1 + $0x2f8] sm:$0xff]   ;;  %v2232_v11 = vld [vmem:[%s2816_s1 + $0x3a0] sm:$0xff]  }
  0x27   :  { %1309 = vmatprep.mubr.bf16.mxu1 %v1726_v15  ;;  %v2236_v15 = vld [vmem:[%s2816_s1 + $0x3a8] sm:$0xff]  }
  0x28   :  { %1928 = vmatpush3.bf16.msra.mxu0 %v2155_v46  ;;  %v2211_v46 = vld [vmem:[%s2816_s1 + $0x238] sm:$0xff]  }
  0x29   :  { %1950 = vmatpush3.bf16.msra.mxu1 %v2156_v47  ;;  %1929 = vmatprep.subr.bf16.mxu0 %v2157_v48  ;;  %v2212_v47 = vld [vmem:[%s2816_s1 + $0x2b8] sm:$0xff]   ;;  %v31_v48 = vld [vmem:[%s2817_s0 + $0x20] sm:$0xff] }
  0x2a   :  { %1951 = vmatprep.subr.bf16.mxu1 %v2158_v49  ;;  %v39_v49 = vld [vmem:[%s2817_s0 + $0x60] sm:$0xff] }
  0x2c   :  { %1930 = vmatpush3.bf16.msra.mxu0 %v2159_v50  ;;  %v32_v50 = vld [vmem:[%s2817_s0 + $0x28] sm:$0xff] }
  0x2d   :  { %1952 = vmatpush3.bf16.msra.mxu1 %v2160_v51  ;;  %1931 = vmatprep.subr.bf16.mxu0 %v2161_v52  ;;  %v40_v51 = vld [vmem:[%s2817_s0 + $0x68] sm:$0xff]  ;;  %v1727_v52 = vcombine.low %v31_v48, %v39_v49 }
  0x2e   :  { %1953 = vmatprep.subr.bf16.mxu1 %v2162_v53  ;;  %v1728_v53 = vcombine.high %v31_v48, %v39_v49  ;;  %v2257_v49 = vld [vmem:[%s2819_s5 + $0x20] sm:$0xff]  }
  0x30   :  { %1932 = vmatpush3.bf16.msra.mxu0 %v2163_v54  ;;  %v1729_v54 = vcombine.low %v32_v50, %v40_v51 }
  0x31   :  { %1954 = vmatpush3.bf16.msra.mxu1 %v2164_v55  ;;  %1933 = vmatprep.subr.bf16.mxu0 %v2165_v56  ;;  %v1730_v55 = vcombine.high %v32_v50, %v40_v51  ;;  %v2213_v56 = vld [vmem:[%s2816_s1 + $0x340] sm:$0xff]  }
  0x32   :  { %1955 = vmatprep.subr.bf16.mxu1 %v2166_v57  ;;  %v2214_v57 = vld [vmem:[%s2816_s1 + $0x3c0] sm:$0xff]  }
  0x34   :  { %1934 = vmatpush3.bf16.msra.mxu0 %v2167_v58  ;;  %v2215_v58 = vld [vmem:[%s2816_s1 + $0x300] sm:$0xff]  }
  0x35   :  { %1956 = vmatpush3.bf16.msra.mxu1 %v2168_v59  ;;  %1935 = vmatprep.subr.bf16.mxu0 %v2169_v60  ;;  %v2216_v59 = vld [vmem:[%s2816_s1 + $0x380] sm:$0xff]   ;;  %v2217_v60 = vld [vmem:[%s2816_s1 + $0x348] sm:$0xff]  }
  0x36   :  { %1957 = vmatprep.subr.bf16.mxu1 %v2170_v61  ;;  %v2218_v61 = vld [vmem:[%s2816_s1 + $0x3c8] sm:$0xff]  }
  0x38   :  { %1936 = vmatpush3.bf16.msra.mxu0 %v2171_v62  ;;  %v2219_v62 = vld [vmem:[%s2816_s1 + $0x308] sm:$0xff]  }
  0x39   :  { %1958 = vmatpush3.bf16.msra.mxu1 %v2172_v63  ;;  %1937 = vmatprep.subr.bf16.mxu0 %v2173_v0  ;;  %v2220_v63 = vld [vmem:[%s2816_s1 + $0x388] sm:$0xff]   ;;  %v2221_v0 = vld [vmem:[%s2816_s1 + $0x350] sm:$0xff]  }
  0x3a   :  { %1959 = vmatprep.subr.bf16.mxu1 %v2174_v1  ;;  %v2222_v1 = vld [vmem:[%s2816_s1 + $0x3d0] sm:$0xff]  }
  0x3c   :  { %1938 = vmatpush3.bf16.msra.mxu0 %v2175_v2  ;;  %v2223_v2 = vld [vmem:[%s2816_s1 + $0x310] sm:$0xff]  }
  0x3d   :  { %1960 = vmatpush3.bf16.msra.mxu1 %v2176_v3  ;;  %1939 = vmatprep.subr.bf16.mxu0 %v2177_v4  ;;  %v2224_v3 = vld [vmem:[%s2816_s1 + $0x390] sm:$0xff]   ;;  %v2225_v4 = vld [vmem:[%s2816_s1 + $0x358] sm:$0xff]  }
  0x3e   :  { %1961 = vmatprep.subr.bf16.mxu1 %v2178_v5  ;;  %v2226_v5 = vld [vmem:[%s2816_s1 + $0x3d8] sm:$0xff]  }
  0x40   :  { %1940 = vmatpush3.bf16.msra.mxu0 %v2179_v6  ;;  %v2227_v6 = vld [vmem:[%s2816_s1 + $0x318] sm:$0xff]  }
  0x41   :  { %1962 = vmatpush3.bf16.msra.mxu1 %v2180_v7  ;;  %1969 = vmatprep.subr.bf16.mxu0 %v2181_v16  ;;  %v2228_v7 = vld [vmem:[%s2816_s1 + $0x398] sm:$0xff]   ;;  %v2237_v16 = vld [vmem:[%s2816_s1 + $0x370] sm:$0xff]  }
  0x42   :  { %1991 = vmatprep.subr.bf16.mxu1 %v2182_v17  ;;  %v2238_v17 = vld [vmem:[%s2816_s1 + $0x3f0] sm:$0xff]  }
  0x43   :  { %1269 = vmatmul.mubr.bf16.vlgmr.msra.gmra.mrb[4].mxu0 %v1723_v10  ;;  %v2231_v10 = vld [vmem:[%s2816_s1 + $0x320] sm:$0xff]  }
  0x44   :  { %1310 = vmatmul.mubr.bf16.vlgmr.msra.gmra.mrb[4].mxu1 %v1725_v14  ;;  %1970 = vmatpush3.bf16.msra.mxu0 %v2183_v18  ;;  %v2235_v14 = vld [vmem:[%s2816_s1 + $0x328] sm:$0xff]   ;;  %v2239_v18 = vld [vmem:[%s2816_s1 + $0x330] sm:$0xff]  }
  0x45   :  { %1992 = vmatpush3.bf16.msra.mxu1 %v2184_v19  ;;  %1971 = vmatprep.subr.bf16.mxu0 %v2185_v20  ;;  %v2240_v19 = vld [vmem:[%s2816_s1 + $0x3b0] sm:$0xff]   ;;  %v2241_v20 = vld [vmem:[%s2816_s1 + $0x378] sm:$0xff]  }
  0x46   :  { %1993 = vmatprep.subr.bf16.mxu1 %v2186_v21  ;;  %1350 = vmatprep.mubr.bf16.mxu0 %v1728_v53  ;;  %v2242_v21 = vld [vmem:[%s2816_s1 + $0x3f8] sm:$0xff]  }
  0x47   :  { %1391 = vmatprep.mubr.bf16.mxu1 %v1730_v55 }
  0x48   :  { %1972 = vmatpush3.bf16.msra.mxu0 %v2187_v22  ;;  %v2243_v22 = vld [vmem:[%s2816_s1 + $0x338] sm:$0xff]  }
  0x49   :  { %1994 = vmatpush3.bf16.msra.mxu1 %v2188_v23  ;;  %1973 = vmatprep.subr.bf16.mxu0 %v2189_v24  ;;  %v2244_v23 = vld [vmem:[%s2816_s1 + $0x3b8] sm:$0xff]   ;;  %v33_v24 = vld [vmem:[%s2817_s0 + $0x30] sm:$0xff] }
  0x4a   :  { %1995 = vmatprep.subr.bf16.mxu1 %v2190_v25  ;;  %v41_v25 = vld [vmem:[%s2817_s0 + $0x70] sm:$0xff] }
  0x4c   :  { %1974 = vmatpush3.bf16.msra.mxu0 %v2191_v26  ;;  %v34_v26 = vld [vmem:[%s2817_s0 + $0x38] sm:$0xff] }
  0x4d   :  { %1996 = vmatpush3.bf16.msra.mxu1 %v2192_v27  ;;  %1975 = vmatprep.subr.bf16.mxu0 %v2193_v28  ;;  %v1731_v27 = vcombine.low %v33_v24, %v41_v25  ;;  %v1732_v28 = vcombine.high %v33_v24, %v41_v25 }
  0x4e   :  { %1997 = vmatprep.subr.bf16.mxu1 %v2194_v29  ;;  %v42_v29 = vld [vmem:[%s2817_s0 + $0x78] sm:$0xff] }
  0x50   :  { %1976 = vmatpush3.bf16.msra.mxu0 %v2195_v30  ;;  %v1733_v30 = vcombine.low %v34_v26, %v42_v29 }
  0x51   :  { %1998 = vmatpush3.bf16.msra.mxu1 %v2196_v31  ;;  %1977 = vmatprep.subr.bf16.mxu0 %v2197_v32  ;;  %v1734_v31 = vcombine.high %v34_v26, %v42_v29  ;;  %v2261_v32 = vmov 0.0  }
  0x52   :  { %1999 = vmatprep.subr.bf16.mxu1 %v2198_v33  ;;  %v2245_v33 = vld [vmem:[%s2818_s3] sm:$0xff]  }
  0x54   :  { %1978 = vmatpush3.bf16.msra.mxu0 %v2199_v34  ;;  %v2246_v34 = vld [vmem:[%s2818_s3 + $0x8] sm:$0xff]  }
  0x55   :  { %2000 = vmatpush3.bf16.msra.mxu1 %v2200_v35  ;;  %1979 = vmatprep.subr.bf16.mxu0 %v2201_v36  ;;  %v2247_v35 = vld [vmem:[%s2818_s3 + $0x10] sm:$0xff]   ;;  %v2248_v36 = vld [vmem:[%s2818_s3 + $0x18] sm:$0xff]  }
  0x56   :  { %2001 = vmatprep.subr.bf16.mxu1 %v2202_v37  ;;  %v2249_v37 = vld [vmem:[%s2818_s3 + $0x20] sm:$0xff]  }
  0x58   :  { %1980 = vmatpush3.bf16.msra.mxu0 %v2203_v38  ;;  %v2250_v38 = vld [vmem:[%s2818_s3 + $0x28] sm:$0xff]  }
  0x59   :  { %2002 = vmatpush3.bf16.msra.mxu1 %v2204_v39  ;;  %1981 = vmatprep.subr.bf16.mxu0 %v2205_v40  ;;  %v2251_v39 = vld [vmem:[%s2818_s3 + $0x30] sm:$0xff]   ;;  %v2252_v40 = vld [vmem:[%s2818_s3 + $0x38] sm:$0xff]  }
  0x5a   :  { %2003 = vmatprep.subr.bf16.mxu1 %v2206_v41  ;;  %v2253_v41 = vld [vmem:[%s2819_s5] sm:$0xff]  }
  0x5c   :  { %1982 = vmatpush3.bf16.msra.mxu0 %v2207_v42  ;;  %v2254_v42 = vld [vmem:[%s2819_s5 + $0x8] sm:$0xff]  }
  0x5d   :  { %2004 = vmatpush3.bf16.msra.mxu1 %v2208_v43  ;;  %1983 = vmatprep.subr.bf16.mxu0 %v2209_v44  ;;  %v2255_v43 = vld [vmem:[%s2819_s5 + $0x10] sm:$0xff]   ;;  %v2256_v44 = vld [vmem:[%s2819_s5 + $0x18] sm:$0xff]  }
  0x5e   :  { %2005 = vmatprep.subr.bf16.mxu1 %v2210_v45 }
  0x60   :  { %1984 = vmatpush3.bf16.msra.mxu0 %v2211_v46 }
  0x61   :  { %2006 = vmatpush3.bf16.msra.mxu1 %v2212_v47  ;;  %2013 = vmatprep.subr.bf16.mxu0 %v2213_v56  ;;  %v1718_v47 = vld [vmem:[%s2820_s2] ss:$0 sm:$0xff] }
  0x62   :  { %2035 = vmatprep.subr.bf16.mxu1 %v2214_v57 }
  0x63   :  { %1351 = vmatmul.mubr.bf16.vlgmr.msra.gmra.mrb[8].mxu0 %v1727_v52 }
  0x64   :  { %1392 = vmatmul.mubr.bf16.vlgmr.msra.gmra.mrb[8].mxu1 %v1729_v54  ;;  %2014 = vmatpush3.bf16.msra.mxu0 %v2215_v58 }
  0x65   :  { %2036 = vmatpush3.bf16.msra.mxu1 %v2216_v59  ;;  %2015 = vmatprep.subr.bf16.mxu0 %v2217_v60  ;;  %v2258_v60 = vld [vmem:[%s2819_s5 + $0x28] sm:$0xff]  }
  0x66   :  { %2037 = vmatprep.subr.bf16.mxu1 %v2218_v61  ;;  %1432 = vmatprep.mubr.bf16.mxu0 %v1732_v28 }
  0x67   :  { %1473 = vmatprep.mubr.bf16.mxu1 %v1734_v31 }
  0x68   :  { %2016 = vmatpush3.bf16.msra.mxu0 %v2219_v62 }
  0x69   :  { %2038 = vmatpush3.bf16.msra.mxu1 %v2220_v63  ;;  %2017 = vmatprep.subr.bf16.mxu0 %v2221_v0 }
  0x6a   :  { %2039 = vmatprep.subr.bf16.mxu1 %v2222_v1 }
  0x6c   :  { %2018 = vmatpush3.bf16.msra.mxu0 %v2223_v2 }
  0x6d   :  { %2040 = vmatpush3.bf16.msra.mxu1 %v2224_v3  ;;  %2019 = vmatprep.subr.bf16.mxu0 %v2225_v4 }
  0x6e   :  { %2041 = vmatprep.subr.bf16.mxu1 %v2226_v5 }
  0x70   :  { %2020 = vmatpush3.bf16.msra.mxu0 %v2227_v6 }
  0x71   :  { %2042 = vmatpush3.bf16.msra.mxu1 %v2228_v7  ;;  %2021 = vmatprep.subr.bf16.mxu0 %v2229_v8 }
  0x72   :  { %2043 = vmatprep.subr.bf16.mxu1 %v2230_v9 }
  0x74   :  { %2022 = vmatpush3.bf16.msra.mxu0 %v2231_v10 }
  0x75   :  { %2044 = vmatpush3.bf16.msra.mxu1 %v2232_v11  ;;  %2023 = vmatprep.subr.bf16.mxu0 %v2233_v12 }
  0x76   :  { %2045 = vmatprep.subr.bf16.mxu1 %v2234_v13 }
  0x78   :  { %2024 = vmatpush3.bf16.msra.mxu0 %v2235_v14 }
  0x79   :  { %2046 = vmatpush3.bf16.msra.mxu1 %v2236_v15  ;;  %2025 = vmatprep.subr.bf16.mxu0 %v2237_v16 }
  0x7a   :  { %2047 = vmatprep.subr.bf16.mxu1 %v2238_v17 }
  0x7c   :  { %2026 = vmatpush3.bf16.msra.mxu0 %v2239_v18 }
  0x7d   :  { %2048 = vmatpush3.bf16.msra.mxu1 %v2240_v19  ;;  %2027 = vmatprep.subr.bf16.mxu0 %v2241_v20 }
  0x7e   :  { %2049 = vmatprep.subr.bf16.mxu1 %v2242_v21 }
  0x80   :  { %2028 = vmatpush3.bf16.msra.mxu0 %v2243_v22 }
  0x81   :  { %2050 = vmatpush3.bf16.msra.mxu1 %v2244_v23  ;;  %2075 = vmatprep.subr.bf16.mxu0 %v2261_v32 }
  0x82   :  { %2095 = vmatprep.subr.bf16.mxu1 %v2261_v32 }
  0x83   :  { %1433 = vmatmul.mubr.bf16.vlgmr.msra.gmra.mrb[12].mxu0 %v1731_v27 }
  0x84   :  { %1474 = vmatmul.mubr.bf16.vlgmr.msra.gmra.mrb[12].mxu1 %v1733_v30  ;;  %2076 = vmatpush3.bf16.msra.mxu0 %v2245_v33 }
  0x85   :  { %2077 = vmatprep.subr.bf16.mxu0 %v2261_v32  ;;  %2091 = vmatprep.mubr.msk.bf16.mxu0 %vm2262_vm0, %v2261_v32 }
  0x86   :  { %2111 = vmatprep.mubr.msk.bf16.mxu1 %vm2262_vm0, %v2261_v32  ;;  %2096 = vmatpush3.bf16.msra.mxu1 %v2253_v41 }
  0x87   :  { %2097 = vmatprep.subr.bf16.mxu1 %v2261_v32 }
  0x88   :  { %2078 = vmatpush3.bf16.msra.mxu0 %v2246_v34 }
  0x89   :  { %2079 = vmatprep.subr.bf16.mxu0 %v2261_v32 }
  0x8a   :  { %2098 = vmatpush3.bf16.msra.mxu1 %v2254_v42 }
  0x8b   :  { %2099 = vmatprep.subr.bf16.mxu1 %v2261_v32 }
  0x8c   :  { %2080 = vmatpush3.bf16.msra.mxu0 %v2247_v35 }
  0x8d   :  { %2081 = vmatprep.subr.bf16.mxu0 %v2261_v32 }
  0x8e   :  { %2100 = vmatpush3.bf16.msra.mxu1 %v2255_v43 }
  0x8f   :  { %2101 = vmatprep.subr.bf16.mxu1 %v2261_v32 }
  0x90   :  { %2082 = vmatpush3.bf16.msra.mxu0 %v2248_v36 }
  0x91   :  { %2083 = vmatprep.subr.bf16.mxu0 %v2261_v32 }
  0x92   :  { %2102 = vmatpush3.bf16.msra.mxu1 %v2256_v44 }
  0x93   :  { %2103 = vmatprep.subr.bf16.mxu1 %v2261_v32 }
  0x94   :  { %2084 = vmatpush3.bf16.msra.mxu0 %v2249_v37 }
  0x95   :  { %2085 = vmatprep.subr.bf16.mxu0 %v2261_v32 }
  0x96   :  { %2104 = vmatpush3.bf16.msra.mxu1 %v2257_v49 }
  0x97   :  { %2105 = vmatprep.subr.bf16.mxu1 %v2261_v32 }
  0x98   :  { %2086 = vmatpush3.bf16.msra.mxu0 %v2250_v38 }
  0x99   :  { %2087 = vmatprep.subr.bf16.mxu0 %v2261_v32 }
  0x9a   :  { %2106 = vmatpush3.bf16.msra.mxu1 %v2258_v60 }
  0x9b   :  { %2107 = vmatprep.subr.bf16.mxu1 %v2261_v32 }
  0x9c   :  { %2088 = vmatpush3.bf16.msra.mxu0 %v2251_v39 }
  0x9d   :  { %2089 = vmatprep.subr.bf16.mxu0 %v2261_v32 }
  0xa0   :  { %2090 = vmatpush3.bf16.msra.mxu0 %v2252_v40 }
  0xf6   :  { %v1897_v45 = vpop.f32.mrb[0].mxu0 }
  0xf7   :  { %v1919_v46 = vpop.f32.mrb[0].mxu1  ;;  %v1898_v48 = vpop.f32.mrb[1].mxu0 }
  0xf8   :  { %v1899_v50 = vadd.f32 %v1898_v48, %v1897_v45  ;;  %v1920_v51 = vpop.f32.mrb[1].mxu1  ;;  %v1900_v52 = vpop.f32.mrb[2].mxu0 }
  0xf9   :  { %v1921_v53 = vadd.f32 %v1920_v51, %v1919_v46  ;;  %v1922_v54 = vpop.f32.mrb[2].mxu1  ;;  %v1901_v55 = vpop.f32.mrb[3].mxu0 }
  0xfa   :  { %v1189_v56 = vadd.f32 %v1899_v50, %v1718_v47  ;;  %v1902_v57 = vadd.f32 %v1901_v55, %v1900_v52  ;;  %v1923_v58 = vpop.f32.mrb[3].mxu1  ;;  %v2259_v52 = vld [vmem:[%s2819_s5 + $0x30] sm:$0xff]  }
  0xfb   :  { %v1924_v59 = vadd.f32 %v1923_v58, %v1922_v54  ;;  %2108 = vmatpush3.bf16.msra.mxu1 %v2259_v52  ;;  %v1863_v54 = vld [vmem:[%s2821_s4] ss:$0 sm:$0xff] }
  0xfc   :  { %v1230_v61 = vadd.f32 %v1921_v53, %v1189_v56  ;;  %v1192_v62 = vadd.f32 %v1902_v57, %v1718_v47  ;;  %2109 = vmatprep.subr.bf16.mxu1 %v2261_v32  ;;  %v2260_v53 = vld [vmem:[%s2819_s5 + $0x38] sm:$0xff]   ;;  %v1872_v32 = vld [vmem:[%s2822_s6] ss:$0 sm:$0xff] }
  0xfe   :  { %v1233_v63 = vadd.f32 %v1924_v59, %v1192_v62 }
  0xff   :  { %2110 = vmatpush3.bf16.msra.mxu1 %v2260_v53 }
 0x116   :  { %v1941_v0 = vpop.f32.mrb[4].mxu0 }
 0x117   :  { %v1963_v1 = vpop.f32.mrb[4].mxu1  ;;  %v1942_v2 = vpop.f32.mrb[5].mxu0 }
 0x118   :  { %v1943_v3 = vadd.f32 %v1942_v2, %v1941_v0  ;;  %v1964_v4 = vpop.f32.mrb[5].mxu1  ;;  %v1944_v5 = vpop.f32.mrb[6].mxu0 }
 0x119   :  { %v1965_v6 = vadd.f32 %v1964_v4, %v1963_v1  ;;  %v1966_v7 = vpop.f32.mrb[6].mxu1  ;;  %v1945_v8 = vpop.f32.mrb[7].mxu0 }
 0x11a   :  { %v1271_v9 = vadd.f32 %v1943_v3, %v1230_v61  ;;  %v1946_v10 = vadd.f32 %v1945_v8, %v1944_v5  ;;  %v1967_v11 = vpop.f32.mrb[7].mxu1 }
 0x11b   :  { %v1968_v12 = vadd.f32 %v1967_v11, %v1966_v7 }
 0x11c   :  { %v1312_v13 = vadd.f32 %v1965_v6, %v1271_v9  ;;  %v1274_v14 = vadd.f32 %v1946_v10, %v1233_v63 }
 0x11e   :  { %v1315_v15 = vadd.f32 %v1968_v12, %v1274_v14 }
 0x136   :  { %v1985_v16 = vpop.f32.mrb[8].mxu0 }
 0x137   :  { %v2007_v17 = vpop.f32.mrb[8].mxu1  ;;  %v1986_v18 = vpop.f32.mrb[9].mxu0 }
 0x138   :  { %v2008_v19 = vpop.f32.mrb[9].mxu1  ;;  %v1987_v20 = vadd.f32 %v1986_v18, %v1985_v16  ;;  %v1988_v22 = vpop.f32.mrb[10].mxu0 }
 0x139   :  { %v2009_v21 = vadd.f32 %v2008_v19, %v2007_v17  ;;  %v2010_v23 = vpop.f32.mrb[10].mxu1  ;;  %v1989_v24 = vpop.f32.mrb[11].mxu0 }
 0x13a   :  { %v2011_v25 = vpop.f32.mrb[11].mxu1  ;;  %v1353_v26 = vadd.f32 %v1987_v20, %v1312_v13  ;;  %v1990_v27 = vadd.f32 %v1989_v24, %v1988_v22 }
 0x13b   :  { %v2012_v28 = vadd.f32 %v2011_v25, %v2010_v23 }
 0x13c   :  { %v1394_v29 = vadd.f32 %v2009_v21, %v1353_v26  ;;  %v1356_v30 = vadd.f32 %v1990_v27, %v1315_v15 }
 0x13e   :  { %v1397_v31 = vadd.f32 %v2012_v28, %v1356_v30 }
 0x156   :  { %v2029_v33 = vpop.f32.mrb[12].mxu0 }
 0x157   :  { %v2051_v34 = vpop.f32.mrb[12].mxu1  ;;  %v2030_v35 = vpop.f32.mrb[13].mxu0 }
 0x158   :  { %v2031_v36 = vadd.f32 %v2030_v35, %v2029_v33  ;;  %v2052_v37 = vpop.f32.mrb[13].mxu1  ;;  %v2032_v38 = vpop.f32.mrb[14].mxu0 }
 0x159   :  { %v2053_v39 = vadd.f32 %v2052_v37, %v2051_v34  ;;  %v2054_v40 = vpop.f32.mrb[14].mxu1  ;;  %v2033_v41 = vpop.f32.mrb[15].mxu0 }
 0x15a   :  { %v1435_v42 = vadd.f32 %v2031_v36, %v1394_v29  ;;  %v2034_v43 = vadd.f32 %v2033_v41, %v2032_v38  ;;  %v2055_v44 = vpop.f32.mrb[15].mxu1 }
 0x15b   :  { %v2056_v45 = vadd.f32 %v2055_v44, %v2054_v40 }
 0x15c   :  { %v1476_v46 = vadd.f32 %v2053_v39, %v1435_v42  ;;  %v1438_v47 = vadd.f32 %v2034_v43, %v1397_v31 }
 0x15e   :  { %v1479_v48 = vadd.f32 %v2056_v45, %v1438_v47  ;;  %v1482_v49 = vmax.f32 %v1476_v46, 0.0 }
 0x160   :  { %v1483_v50 = vmax.f32 %v1479_v48, 0.0 }
 0x162   :  { %v1484_v51 = vpack.c.bf16 %v1483_v50, %v1482_v49 }
 0x164   :  { %2092 = vmatmul.mubr.bf16.vlgmr.msra.gmra.mrb[16].mxu0 %v1484_v51 }
 0x237   :  { %v1590_v55 = vpop.f32.mrb[16].mxu0 }
 0x238   :  { %v1591_v56 = vadd.f32 %v1863_v54, %v1590_v55  ;;  %v2093_v57 = vpop.f32.mrb[17].mxu0 }
 0x239   :  { %v1593_v58 = vpop.f32.mrb[18].mxu0 }
 0x23a   :  { %v1594_v59 = vadd.f32 %v1863_v54, %v1593_v58  ;;  %v2094_v60 = vpop.f32.mrb[19].mxu0  ;;  %v1597_v61 = vmax.f32 %v1591_v56, 0.0 }
 0x23c   :  { %v1598_v62 = vmax.f32 %v1594_v59, 0.0 }
 0x23e   :  { %v1599_v63 = vpack.c.bf16 %v1598_v62, %v1597_v61 }
 0x240   :  { %2112 = vmatmul.mubr.bf16.vlgmr.msra.gmra.mrb[16].mxu1 %v1599_v63 }
 0x313   :  { %v1705_v0 = vpop.f32.mrb[16].mxu1 }
 0x314   :  { %v1706_v1 = vadd.f32 %v1872_v32, %v1705_v0  ;;  %v2113_v2 = vpop.f32.mrb[17].mxu1 }
 0x315   :  { %v1708_v3 = vpop.f32.mrb[18].mxu1 }
 0x316   :  { %1712 = vst [vmem:[%s2823_s7] sm:$0xff] %v1706_v1  ;;  %v1709_v4 = vadd.f32 %v1872_v32, %v1708_v3  ;;  %v2114_v5 = vpop.f32.mrb[19].mxu1 }
 0x318   :  { %1713 = vst [vmem:[%s2823_s7 + $0x8] sm:$0xff] %v1709_v4 }

</bundles_post_ra>
